<compile_context>
chip_gen: v6e
topology: v6e:2x2x1
jax: 0.10.0
libtpu: 0.0.40
codegen_flags: <defaults>
</compile_context>

<pallas_src>
import functools
import math

import numpy as np
import jax
import jax.numpy as jnp
from jax.experimental import pallas as pl
from jax.experimental.pallas import tpu as pltpu

# The reference PyTorch model is f32; force full-precision f32 matmuls so the
# Pallas kernels and the pure-JAX reference agree tightly.
jax.config.update("jax_default_matmul_precision", "highest")


# ----------------------------------------------------------------------------
# Lane-dense LayerNorm over the last two dims ([max_position, pos_dim])
# (rows flattened to S*D so loads/stores are 128-lane aligned)
# ----------------------------------------------------------------------------

def _layernorm_flat_kernel(x_ref, g_ref, b_ref, o_ref, *, eps):
    sd = g_ref.shape[-1]
    x = x_ref[...].reshape(1, sd).astype(jnp.float32)
    mu = jnp.mean(x, keepdims=True)
    xc = x - mu
    var = jnp.mean(xc * xc, keepdims=True)
    y = xc * jax.lax.rsqrt(var + eps) * g_ref[...] + b_ref[...]
    o_ref[...] = y.reshape(o_ref.shape).astype(o_ref.dtype)


def pallas_layernorm2d(x, gamma_flat, beta_flat, eps=1e-5):
    """x: (B, S, D); gamma_flat/beta_flat: (1, S*D) (prepared once)."""
    B, S, D = x.shape
    SD = S * D
    xf = x.reshape(B, 1, SD)
    out = pl.pallas_call(
        functools.partial(_layernorm_flat_kernel, eps=eps),
        out_shape=jax.ShapeDtypeStruct((B, 1, SD), x.dtype),
        grid=(B,),
        in_specs=[pl.BlockSpec((1, 1, SD), lambda b: (b, 0, 0)),
                  pl.BlockSpec((1, SD), lambda b: (0, 0)),
                  pl.BlockSpec((1, SD), lambda b: (0, 0))],
        out_specs=pl.BlockSpec((1, 1, SD), lambda b: (b, 0, 0)),
        compiler_params=pltpu.CompilerParams(dimension_semantics=("parallel",)),
    )(xf, gamma_flat, beta_flat)
    return out.reshape(B, S, D)


# ----------------------------------------------------------------------------
# Fused encoder layer:
#   QKV projection -> per-head attention (mult. mask, softmax) -> FFN(3x relu)
#   -> residual -> LayerNorm([S, D])    -- one pallas_call per layer, grid=(B,)
# ----------------------------------------------------------------------------

def _encoder_layer_kernel(x_ref, m_ref, wqkv_ref, w1_ref, b1_ref, wi_ref,
                          bi_ref, w2_ref, b2_ref, g_ref, beta_ref, o_ref, *,
                          n_heads, eps):
    S, D = g_ref.shape
    x = x_ref[...].reshape(S, D).astype(jnp.float32)
    m = m_ref[...].reshape(S, 1).astype(jnp.float32)

    # ---- fused QKV projection (no bias: attention_use_bias=False default) ----
    qkv = jnp.dot(x, wqkv_ref[...], preferred_element_type=jnp.float32)  # (S,3D)

    dh = D // n_heads
    scale = 1.0 / math.sqrt(float(dh))
    ctx_heads = []
    for h in range(n_heads):                     # statically unrolled (tiny H)
        q = qkv[:, h * dh:(h + 1) * dh]
        k = qkv[:, D + h * dh:D + (h + 1) * dh]
        v = qkv[:, 2 * D + h * dh:2 * D + (h + 1) * dh]
        s = jax.lax.dot_general(q, k, (((1,), (1,)), ((), ())),
                                preferred_element_type=jnp.float32) * scale
        s = s * m                                # multiplicative query-row mask
        s = s - jnp.max(s, axis=-1, keepdims=True)
        p = jnp.exp(s)
        denom = jnp.sum(p, axis=-1, keepdims=True)
        p = p * pl.reciprocal(denom, approx=False)
        ctx_heads.append(jnp.dot(p, v, preferred_element_type=jnp.float32))
    ctx = jnp.concatenate(ctx_heads, axis=-1)    # (S, D)

    # ---- FFN chain with fused bias + ReLU (all weights VMEM-resident) ----
    h1 = jnp.maximum(
        jnp.dot(ctx, w1_ref[...], preferred_element_type=jnp.float32)
        + b1_ref[...], 0.0)
    h2 = jnp.maximum(
        jnp.dot(h1, wi_ref[...], preferred_element_type=jnp.float32)
        + bi_ref[...], 0.0)
    h3 = jnp.maximum(
        jnp.dot(h2, w2_ref[...], preferred_element_type=jnp.float32)
        + b2_ref[...], 0.0)

    # ---- residual + LayerNorm over [S, D] ----
    y = h3 + x
    mu = jnp.mean(y, keepdims=True)
    yc = y - mu
    var = jnp.mean(yc * yc, keepdims=True)
    y = yc * jax.lax.rsqrt(var + eps) * g_ref[...] + beta_ref[...]
    o_ref[...] = y.reshape(o_ref.shape).astype(o_ref.dtype)


def pallas_encoder_layer(x, mask_q, layer, *, n_heads, eps=1e-5):
    B, S, D = x.shape
    inter = layer["wi_t"].shape[1]

    def full(shape):
        return pl.BlockSpec(shape, lambda b, _s=shape: (0,) * len(_s))

    row = pl.BlockSpec((1, S, D), lambda b: (b, 0, 0))
    return pl.pallas_call(
        functools.partial(_encoder_layer_kernel, n_heads=n_heads, eps=eps),
        out_shape=jax.ShapeDtypeStruct((B, S, D), x.dtype),
        grid=(B,),
        in_specs=[
            row,                                            # x
            pl.BlockSpec((1, S, 1), lambda b: (b, 0, 0)),   # mask (per query)
            full((D, 3 * D)),                               # wqkv_t
            full((D, D)), full((1, D)),                     # w1_t, b1
            full((D, inter)), full((1, inter)),             # wi_t, bi
            full((inter, D)), full((1, D)),                 # w2_t, b2
            full((S, D)), full((S, D)),                     # ln_g, ln_b
        ],
        out_specs=row,
        compiler_params=pltpu.CompilerParams(
            dimension_semantics=("parallel",)),
    )(x, mask_q, layer["wqkv_t"], layer["w1_t"], layer["b1"],
      layer["wi_t"], layer["bi"], layer["w2_t"], layer["b2"],
      layer["ln_g"], layer["ln_b"])


# ----------------------------------------------------------------------------
# Pointer head: logits = (x @ Wp^T + bp) * mask  (output padded to 128 lanes)
# ----------------------------------------------------------------------------

def _pointer_kernel(x_ref, wp_ref, bp_ref, m_ref, o_ref):
    S, D = x_ref.shape[1], x_ref.shape[2]
    x = x_ref[...].reshape(S, D).astype(jnp.float32)
    logits = jnp.dot(x, wp_ref[...], preferred_element_type=jnp.float32)
    logits = logits + bp_ref[...]
    logits = logits * m_ref[...].reshape(S, 1).astype(jnp.float32)
    o_ref[...] = logits.reshape(o_ref.shape).astype(o_ref.dtype)


def pallas_pointer(x, wp_t_pad, bp_pad, mask_q):
    B, S, D = x.shape
    Np = wp_t_pad.shape[1]            # 128-lane padded output width
    return pl.pallas_call(
        _pointer_kernel,
        out_shape=jax.ShapeDtypeStruct((B, S, Np), x.dtype),
        grid=(B,),
        in_specs=[pl.BlockSpec((1, S, D), lambda b: (b, 0, 0)),
                  pl.BlockSpec((D, Np), lambda b: (0, 0)),
                  pl.BlockSpec((1, Np), lambda b: (0, 0)),
                  pl.BlockSpec((1, S, 1), lambda b: (b, 0, 0))],
        out_specs=pl.BlockSpec((1, S, Np), lambda b: (b, 0, 0)),
        compiler_params=pltpu.CompilerParams(dimension_semantics=("parallel",)),
    )(x, wp_t_pad, bp_pad, mask_q)


# ----------------------------------------------------------------------------
# One-time parameter preparation (pre-transpose / concat / pad -- hoisted out
# of the forward path per the perf review)
# ----------------------------------------------------------------------------

def prepare_params(params):
    dim = params["word_emb"].shape[1]
    S = params["pos_emb"].shape[0]
    n_out = params["wp"].shape[0]
    n_pad = max(128, n_out)
    prepped = {
        "word_emb": params["word_emb"],
        "seg_emb": params["seg_emb"],
        "pos_emb": params["pos_emb"],
        "ln0_g": params["ln0_g"].reshape(1, S * dim),
        "ln0_b": params["ln0_b"].reshape(1, S * dim),
        "wp_t": jnp.pad(params["wp"].T, ((0, 0), (0, n_pad - n_out))),
        "bp": jnp.pad(params["bp"].reshape(1, n_out),
                      ((0, 0), (0, n_pad - n_out))),
        "layers": [],
    }
    for layer in params["layers"]:
        prepped["layers"].append({
            "wqkv_t": jnp.concatenate(
                [layer["wq"], layer["wk"], layer["wv"]], axis=0).T,  # (D, 3D)
            "w1_t": layer["w1"].T, "b1": layer["b1"].reshape(1, -1),
            "wi_t": layer["wi"].T, "bi": layer["bi"].reshape(1, -1),
            "w2_t": layer["w2"].T, "b2": layer["b2"].reshape(1, -1),
            "ln_g": layer["ln_g"], "ln_b": layer["ln_b"],
        })
    return prepped


# ----------------------------------------------------------------------------
# ModelBaseLine forward (Pallas path)
# ----------------------------------------------------------------------------

def model_forward(prepped, input_ids, input_mask, segment_ids, *, n_heads):
    B, S = input_ids.shape
    dim = prepped["word_emb"].shape[1]

    # LocalBert embedding + position embedding + LayerNorm([S, D]).
    # TODO(synk): the embedding row-gather stays in plain JAX (jnp.take); a
    # Pallas scalar-prefetch gather kernel is possible but low value here.
    word = jnp.take(prepped["word_emb"], input_ids.reshape(-1), axis=0)
    seg = jnp.take(prepped["seg_emb"], segment_ids.reshape(-1), axis=0)
    emb = (word + seg).reshape(B, S, dim) + prepped["pos_emb"][None, :, :]
    x = pallas_layernorm2d(emb, prepped["ln0_g"], prepped["ln0_b"])
    # TODO(synk): use_conv=True path (DepthwiseSeparableConv) not implemented;
    # the reference config uses use_conv=False so it is skipped here.
    # Dropout modules are defined but never applied in the reference forward.

    mask_q = input_mask.astype(x.dtype).reshape(B, S, 1)

    for layer in prepped["layers"]:
        x = pallas_encoder_layer(x, mask_q, layer, n_heads=n_heads)

    # Pointer head (fused linear + bias + multiplicative seq mask).
    # TODO(synk): the `mask(embeddings, input_mask, -2)` helper is not defined
    # in the spec; implemented as multiplicative masking along the seq dim.
    logits = pallas_pointer(x, prepped["wp_t"], prepped["bp"], mask_q)
    return logits[:, :, 0], logits[:, :, 1]


# ----------------------------------------------------------------------------
# Parameter init and pure-JAX reference (for validation)
# ----------------------------------------------------------------------------

def init_params(key, vocab_size, type_vocab_size, max_position, dim,
                n_layers, inter_dim):
    ks = jax.random.split(key, 5 + n_layers)

    def dense(k, n_out, n_in):
        return jax.random.normal(k, (n_out, n_in), jnp.float32) / math.sqrt(n_in)

    def bias(k, n):
        return jax.random.uniform(k, (n,), jnp.float32, minval=-0.05, maxval=0.05)

    params = {
        "word_emb": jax.random.normal(ks[0], (vocab_size, dim), jnp.float32) * 0.1,
        "seg_emb": jax.random.normal(ks[1], (type_vocab_size, dim), jnp.float32) * 0.1,
        "pos_emb": jax.random.normal(ks[2], (max_position, dim), jnp.float32) * 0.1,
        "ln0_g": jnp.ones((max_position, dim), jnp.float32),
        "ln0_b": jnp.zeros((max_position, dim), jnp.float32),
        "wp": dense(ks[3], 2, dim),
        "bp": bias(ks[4], 2),
        "layers": [],
    }
    for i in range(n_layers):
        lk = jax.random.split(ks[5 + i], 9)
        params["layers"].append({
            "wq": dense(lk[0], dim, dim),
            "wk": dense(lk[1], dim, dim),
            "wv": dense(lk[2], dim, dim),
            "w1": dense(lk[3], dim, dim), "b1": bias(lk[4], dim),
            "wi": dense(lk[5], inter_dim, dim), "bi": bias(lk[6], inter_dim),
            "w2": dense(lk[7], dim, inter_dim), "b2": bias(lk[8], dim),
            "ln_g": jnp.ones((max_position, dim), jnp.float32),
            "ln_b": jnp.zeros((max_position, dim), jnp.float32),
        })
    return params


def reference_forward(params, input_ids, input_mask, segment_ids, *, n_heads,
                      eps=1e-5):
    B, S = input_ids.shape
    dim = params["word_emb"].shape[1]
    hd = dim // n_heads

    def ln2d(x, g, b):
        mu = jnp.mean(x, axis=(-2, -1), keepdims=True)
        var = jnp.mean((x - mu) ** 2, axis=(-2, -1), keepdims=True)
        return (x - mu) / jnp.sqrt(var + eps) * g + b

    emb = (params["word_emb"][input_ids.reshape(-1)]
           + params["seg_emb"][segment_ids.reshape(-1)]).reshape(B, S, dim)
    emb = emb + params["pos_emb"][None, :, :]
    x = ln2d(emb, params["ln0_g"], params["ln0_b"])
    maskf = input_mask.astype(jnp.float32)

    for layer in params["layers"]:
        pre = x
        q = x @ layer["wq"].T
        k = x @ layer["wk"].T
        v = x @ layer["wv"].T
        q4 = q.reshape(B, S, n_heads, hd).transpose(0, 2, 1, 3)
        k4 = k.reshape(B, S, n_heads, hd).transpose(0, 2, 1, 3)
        v4 = v.reshape(B, S, n_heads, hd).transpose(0, 2, 1, 3)
        s = jnp.einsum("bhqd,bhkd->bhqk", q4, k4) / math.sqrt(hd)
        s = s * maskf[:, None, :, None]
        p = jax.nn.softmax(s, axis=-1)
        ctx = jnp.einsum("bhqk,bhkd->bhqd", p, v4)
        ctx = ctx.transpose(0, 2, 1, 3).reshape(B, S, dim)
        h = jax.nn.relu(ctx @ layer["w1"].T + layer["b1"])
        h = jax.nn.relu(h @ layer["wi"].T + layer["bi"])
        h = jax.nn.relu(h @ layer["w2"].T + layer["b2"])
        h = h + pre
        x = ln2d(h, layer["ln_g"], layer["ln_b"])

    logits = x @ params["wp"].T + params["bp"]
    logits = logits * maskf[:, :, None]
    return logits[:, :, 0], logits[:, :, 1]


# ----------------------------------------------------------------------------

if __name__ == "__main__":
    key = jax.random.PRNGKey(0)
    kp, kid, kseg = jax.random.split(key, 3)

    # Small shapes consistent with the module: batch=2, max_position(seq)=8,
    # hidden=32, 4 heads, intermediate=64, 2 encoder layers.
    batch, seq, dim = 2, 8, 32
    n_heads, inter_dim, n_layers = 4, 64, 2
    vocab_size, type_vocab_size = 50, 2

    params = init_params(kp, vocab_size, type_vocab_size, seq, dim,
                         n_layers, inter_dim)
    prepped = prepare_params(params)      # one-time weight transpose/concat/pad

    input_ids = jax.random.randint(kid, (batch, seq), 0, vocab_size)
    segment_ids = jax.random.randint(kseg, (batch, seq), 0, type_vocab_size)
    input_mask = jnp.ones((batch, seq), jnp.float32).at[1, 6:].set(0.0)

    fwd = jax.jit(functools.partial(model_forward, n_heads=n_heads))
    start, end = fwd(prepped, input_ids, input_mask, segment_ids)
    start, end = jax.block_until_ready((start, end))
    assert start.shape == (batch, seq) and end.shape == (batch, seq)

    ref_start, ref_end = reference_forward(params, input_ids, input_mask,
                                           segment_ids, n_heads=n_heads)
    np.testing.assert_allclose(np.asarray(start), np.asarray(ref_start),
                               rtol=1e-4, atol=1e-4)
    np.testing.assert_allclose(np.asarray(end), np.asarray(ref_end),
                               rtol=1e-4, atol=1e-4)

    print("KERNEL_OK")
</pallas_src>

<mosaic_0001>
module attributes {stable_mosaic.version = 11 : i64} {
  func.func @_layernorm_flat_kernel(%arg0: i32, %arg1: memref<1x1x256xf32, #tpu.memory_space<vmem>>, %arg2: memref<1x256xf32, #tpu.memory_space<vmem>>, %arg3: memref<1x256xf32, #tpu.memory_space<vmem>>, %arg4: memref<1x1x256xf32, #tpu.memory_space<vmem>>) attributes {dimension_semantics = [#tpu.dimension_semantics<parallel>], iteration_bounds = array<i64: 2>, scalar_prefetch = 0 : i64, scratch_operands = 0 : i64, tpu.core_type = #tpu.core_type<tc>, window_params = [{transform_indices = @transform_0, window_bounds = array<i64: 1, 1, 256>}, {pipeline_mode = #tpu.pipeline_mode<synchronous>, transform_indices = @transform_1, window_bounds = array<i64: 1, 256>}, {pipeline_mode = #tpu.pipeline_mode<synchronous>, transform_indices = @transform_2, window_bounds = array<i64: 1, 256>}, {transform_indices = @transform_3, window_bounds = array<i64: 1, 1, 256>}]} {
    %c0 = arith.constant 0 : index
    %c0_0 = arith.constant 0 : index
    %c0_1 = arith.constant 0 : index
    %0 = vector.load %arg1[%c0, %c0_0, %c0_1] : memref<1x1x256xf32, #tpu.memory_space<vmem>>, vector<1x1x256xf32>
    %1 = vector.shape_cast %0 : vector<1x1x256xf32> to vector<1x256xf32>
    %2 = vector.shape_cast %1 : vector<1x256xf32> to vector<1x1x256xf32>
    %cst = arith.constant dense<0.000000e+00> : vector<1xf32>
    %3 = vector.multi_reduction <add>, %2, %cst [1, 2] : vector<1x1x256xf32> to vector<1xf32>
    %4 = vector.shape_cast %3 : vector<1xf32> to vector<1x1x1xf32>
    %5 = vector.extract %4[0, 0, 0] : f32 from vector<1x1x1xf32>
    %6 = vector.broadcast %5 : f32 to vector<1x1xf32>
    %cst_2 = arith.constant 2.560000e+02 : f32
    %7 = vector.broadcast %cst_2 : f32 to vector<1x1xf32>
    %8 = arith.divf %6, %7 : vector<1x1xf32>
    %9 = vector.broadcast %8 : vector<1x1xf32> to vector<1x256xf32>
    %10 = arith.subf %1, %9 : vector<1x256xf32>
    %11 = arith.mulf %10, %10 : vector<1x256xf32>
    %12 = vector.shape_cast %11 : vector<1x256xf32> to vector<1x1x256xf32>
    %cst_3 = arith.constant dense<0.000000e+00> : vector<1xf32>
    %13 = vector.multi_reduction <add>, %12, %cst_3 [1, 2] : vector<1x1x256xf32> to vector<1xf32>
    %14 = vector.shape_cast %13 : vector<1xf32> to vector<1x1x1xf32>
    %15 = vector.extract %14[0, 0, 0] : f32 from vector<1x1x1xf32>
    %16 = vector.broadcast %15 : f32 to vector<1x1xf32>
    %cst_4 = arith.constant 2.560000e+02 : f32
    %17 = vector.broadcast %cst_4 : f32 to vector<1x1xf32>
    %18 = arith.divf %16, %17 : vector<1x1xf32>
    %cst_5 = arith.constant 9.99999974E-6 : f32
    %19 = vector.broadcast %cst_5 : f32 to vector<1x1xf32>
    %20 = arith.addf %18, %19 : vector<1x1xf32>
    %21 = math.rsqrt %20 : vector<1x1xf32>
    %22 = vector.broadcast %21 : vector<1x1xf32> to vector<1x256xf32>
    %23 = arith.mulf %10, %22 : vector<1x256xf32>
    %c0_6 = arith.constant 0 : index
    %c0_7 = arith.constant 0 : index
    %24 = vector.load %arg2[%c0_6, %c0_7] : memref<1x256xf32, #tpu.memory_space<vmem>>, vector<1x256xf32>
    %25 = arith.mulf %23, %24 : vector<1x256xf32>
    %c0_8 = arith.constant 0 : index
    %c0_9 = arith.constant 0 : index
    %26 = vector.load %arg3[%c0_8, %c0_9] : memref<1x256xf32, #tpu.memory_space<vmem>>, vector<1x256xf32>
    %27 = arith.addf %25, %26 : vector<1x256xf32>
    %28 = vector.shape_cast %27 : vector<1x256xf32> to vector<1x1x256xf32>
    %c0_10 = arith.constant 0 : index
    %c0_11 = arith.constant 0 : index
    %c0_12 = arith.constant 0 : index
    %29 = vector.load %arg4[%c0_10, %c0_11, %c0_12] : memref<1x1x256xf32, #tpu.memory_space<vmem>>, vector<1x1x256xf32>
    tpu.vector_store %arg4[%c0_10, %c0_11, %c0_12], %28 {strides = array<i32>} : memref<1x1x256xf32, #tpu.memory_space<vmem>>, vector<1x1x256xf32>,
    return
  }
  func.func @transform_0(%arg0: i32) -> (i32, i32, i32) {
    %c0_i32 = arith.constant 0 : i32
    %c0_i32_0 = arith.constant 0 : i32
    %c0_i32_1 = arith.constant 0 : i32
    return %arg0, %c0_i32, %c0_i32_0 : i32, i32, i32
  }
  func.func @transform_1(%arg0: i32) -> (i32, i32) {
    %c0_i32 = arith.constant 0 : i32
    %c0_i32_0 = arith.constant 0 : i32
    %c0_i32_1 = arith.constant 0 : i32
    return %c0_i32, %c0_i32_0 : i32, i32
  }
  func.func @transform_2(%arg0: i32) -> (i32, i32) {
    %c0_i32 = arith.constant 0 : i32
    %c0_i32_0 = arith.constant 0 : i32
    %c0_i32_1 = arith.constant 0 : i32
    return %c0_i32, %c0_i32_0 : i32, i32
  }
  func.func @transform_3(%arg0: i32) -> (i32, i32, i32) {
    %c0_i32 = arith.constant 0 : i32
    %c0_i32_0 = arith.constant 0 : i32
    %c0_i32_1 = arith.constant 0 : i32
    return %arg0, %c0_i32, %c0_i32_0 : i32, i32, i32
  }
}

module attributes {stable_mosaic.version = 11 : i64} {
  func.func @_pointer_kernel(%arg0: i32, %arg1: memref<1x8x32xf32, #tpu.memory_space<vmem>>, %arg2: memref<32x128xf32, #tpu.memory_space<vmem>>, %arg3: memref<1x128xf32, #tpu.memory_space<vmem>>, %arg4: memref<1x8x1xf32, #tpu.memory_space<vmem>>, %arg5: memref<1x8x128xf32, #tpu.memory_space<vmem>>) attributes {dimension_semantics = [#tpu.dimension_semantics<parallel>], iteration_bounds = array<i64: 2>, scalar_prefetch = 0 : i64, scratch_operands = 0 : i64, tpu.core_type = #tpu.core_type<tc>, window_params = [{transform_indices = @transform_0, window_bounds = array<i64: 1, 8, 32>}, {pipeline_mode = #tpu.pipeline_mode<synchronous>, transform_indices = @transform_1, window_bounds = array<i64: 32, 128>}, {pipeline_mode = #tpu.pipeline_mode<synchronous>, transform_indices = @transform_2, window_bounds = array<i64: 1, 128>}, {transform_indices = @transform_3, window_bounds = array<i64: 1, 8, 1>}, {transform_indices = @transform_4, window_bounds = array<i64: 1, 8, 128>}]} {
    %c0 = arith.constant 0 : index
    %c0_0 = arith.constant 0 : index
    %c0_1 = arith.constant 0 : index
    %0 = vector.load %arg1[%c0, %c0_0, %c0_1] : memref<1x8x32xf32, #tpu.memory_space<vmem>>, vector<1x8x32xf32>
    %1 = vector.shape_cast %0 : vector<1x8x32xf32> to vector<8x32xf32>
    %c0_2 = arith.constant 0 : index
    %c0_3 = arith.constant 0 : index
    %2 = vector.load %arg2[%c0_2, %c0_3] : memref<32x128xf32, #tpu.memory_space<vmem>>, vector<32x128xf32>
    %cst = arith.constant dense<0.000000e+00> : vector<8x128xf32>
    %3 = tpu.matmul %1, %2, %cst {dimension_numbers = #tpu.dot_dimension_numbers<[1], [0], [0], [1], [0, 0, 1, 1], [], []>, precision = #tpu.contract_precision<fp32>} : vector<8x32xf32>, vector<32x128xf32>, vector<8x128xf32> -> vector<8x128xf32>
    %c0_4 = arith.constant 0 : index
    %c0_5 = arith.constant 0 : index
    %4 = vector.load %arg3[%c0_4, %c0_5] : memref<1x128xf32, #tpu.memory_space<vmem>>, vector<1x128xf32>
    %5 = vector.broadcast %4 : vector<1x128xf32> to vector<8x128xf32>
    %6 = arith.addf %3, %5 : vector<8x128xf32>
    %c0_6 = arith.constant 0 : index
    %c0_7 = arith.constant 0 : index
    %c0_8 = arith.constant 0 : index
    %7 = vector.load %arg4[%c0_6, %c0_7, %c0_8] : memref<1x8x1xf32, #tpu.memory_space<vmem>>, vector<1x8x1xf32>
    %8 = vector.shape_cast %7 : vector<1x8x1xf32> to vector<8x1xf32>
    %9 = vector.broadcast %8 : vector<8x1xf32> to vector<8x128xf32>
    %10 = arith.mulf %6, %9 : vector<8x128xf32>
    %11 = vector.shape_cast %10 : vector<8x128xf32> to vector<1x8x128xf32>
    %c0_9 = arith.constant 0 : index
    %c0_10 = arith.constant 0 : index
    %c0_11 = arith.constant 0 : index
    %12 = vector.load %arg5[%c0_9, %c0_10, %c0_11] : memref<1x8x128xf32, #tpu.memory_space<vmem>>, vector<1x8x128xf32>
    tpu.vector_store %arg5[%c0_9, %c0_10, %c0_11], %11 {strides = array<i32>} : memref<1x8x128xf32, #tpu.memory_space<vmem>>, vector<1x8x128xf32>,
    return
  }
  func.func @transform_0(%arg0: i32) -> (i32, i32, i32) {
    %c0_i32 = arith.constant 0 : i32
    %c0_i32_0 = arith.constant 0 : i32
    %c0_i32_1 = arith.constant 0 : i32
    return %arg0, %c0_i32, %c0_i32_0 : i32, i32, i32
  }
  func.func @transform_1(%arg0: i32) -> (i32, i32) {
    %c0_i32 = arith.constant 0 : i32
    %c0_i32_0 = arith.constant 0 : i32
    %c0_i32_1 = arith.constant 0 : i32
    return %c0_i32, %c0_i32_0 : i32, i32
  }
  func.func @transform_2(%arg0: i32) -> (i32, i32) {
    %c0_i32 = arith.constant 0 : i32
    %c0_i32_0 = arith.constant 0 : i32
    %c0_i32_1 = arith.constant 0 : i32
    return %c0_i32, %c0_i32_0 : i32, i32
  }
  func.func @transform_3(%arg0: i32) -> (i32, i32, i32) {
    %c0_i32 = arith.constant 0 : i32
    %c0_i32_0 = arith.constant 0 : i32
    %c0_i32_1 = arith.constant 0 : i32
    return %arg0, %c0_i32, %c0_i32_0 : i32, i32, i32
  }
  func.func @transform_4(%arg0: i32) -> (i32, i32, i32) {
    %c0_i32 = arith.constant 0 : i32
    %c0_i32_0 = arith.constant 0 : i32
    %c0_i32_1 = arith.constant 0 : i32
    return %arg0, %c0_i32, %c0_i32_0 : i32, i32, i32
  }
}

module attributes {stable_mosaic.version = 11 : i64} {
  func.func @_encoder_layer_kernel(%arg0: i32, %arg1: memref<1x8x32xf32, #tpu.memory_space<vmem>>, %arg2: memref<1x8x1xf32, #tpu.memory_space<vmem>>, %arg3: memref<32x96xf32, #tpu.memory_space<vmem>>, %arg4: memref<32x32xf32, #tpu.memory_space<vmem>>, %arg5: memref<1x32xf32, #tpu.memory_space<vmem>>, %arg6: memref<32x64xf32, #tpu.memory_space<vmem>>, %arg7: memref<1x64xf32, #tpu.memory_space<vmem>>, %arg8: memref<64x32xf32, #tpu.memory_space<vmem>>, %arg9: memref<1x32xf32, #tpu.memory_space<vmem>>, %arg10: memref<8x32xf32, #tpu.memory_space<vmem>>, %arg11: memref<8x32xf32, #tpu.memory_space<vmem>>, %arg12: memref<1x8x32xf32, #tpu.memory_space<vmem>>) attributes {dimension_semantics = [#tpu.dimension_semantics<parallel>], iteration_bounds = array<i64: 2>, scalar_prefetch = 0 : i64, scratch_operands = 0 : i64, tpu.core_type = #tpu.core_type<tc>, window_params = [{transform_indices = @transform_0, window_bounds = array<i64: 1, 8, 32>}, {transform_indices = @transform_1, window_bounds = array<i64: 1, 8, 1>}, {pipeline_mode = #tpu.pipeline_mode<synchronous>, transform_indices = @transform_2, window_bounds = array<i64: 32, 96>}, {pipeline_mode = #tpu.pipeline_mode<synchronous>, transform_indices = @transform_3, window_bounds = array<i64: 32, 32>}, {pipeline_mode = #tpu.pipeline_mode<synchronous>, transform_indices = @transform_4, window_bounds = array<i64: 1, 32>}, {pipeline_mode = #tpu.pipeline_mode<synchronous>, transform_indices = @transform_5, window_bounds = array<i64: 32, 64>}, {pipeline_mode = #tpu.pipeline_mode<synchronous>, transform_indices = @transform_6, window_bounds = array<i64: 1, 64>}, {pipeline_mode = #tpu.pipeline_mode<synchronous>, transform_indices = @transform_7, window_bounds = array<i64: 64, 32>}, {pipeline_mode = #tpu.pipeline_mode<synchronous>, transform_indices = @transform_8, window_bounds = array<i64: 1, 32>}, {pipeline_mode = #tpu.pipeline_mode<synchronous>, transform_indices = @transform_9, window_bounds = array<i64: 8, 32>}, {pipeline_mode = #tpu.pipeline_mode<synchronous>, transform_indices = @transform_10, window_bounds = array<i64: 8, 32>}, {transform_indices = @transform_11, window_bounds = array<i64: 1, 8, 32>}]} {
    %c0 = arith.constant 0 : index
    %c0_0 = arith.constant 0 : index
    %c0_1 = arith.constant 0 : index
    %0 = vector.load %arg1[%c0, %c0_0, %c0_1] : memref<1x8x32xf32, #tpu.memory_space<vmem>>, vector<1x8x32xf32>
    %1 = vector.shape_cast %0 : vector<1x8x32xf32> to vector<8x32xf32>
    %c0_2 = arith.constant 0 : index
    %c0_3 = arith.constant 0 : index
    %c0_4 = arith.constant 0 : index
    %2 = vector.load %arg2[%c0_2, %c0_3, %c0_4] : memref<1x8x1xf32, #tpu.memory_space<vmem>>, vector<1x8x1xf32>
    %3 = vector.shape_cast %2 : vector<1x8x1xf32> to vector<8x1xf32>
    %c0_5 = arith.constant 0 : index
    %c0_6 = arith.constant 0 : index
    %4 = vector.load %arg3[%c0_5, %c0_6] : memref<32x96xf32, #tpu.memory_space<vmem>>, vector<32x96xf32>
    %cst = arith.constant dense<0.000000e+00> : vector<8x96xf32>
    %5 = tpu.matmul %1, %4, %cst {dimension_numbers = #tpu.dot_dimension_numbers<[1], [0], [0], [1], [0, 0, 1, 1], [], []>, precision = #tpu.contract_precision<fp32>} : vector<8x32xf32>, vector<32x96xf32>, vector<8x96xf32> -> vector<8x96xf32>
    %6 = vector.extract_strided_slice %5 {offsets = [0, 0], sizes = [8, 8], strides = [1, 1]} : vector<8x96xf32> to vector<8x8xf32>
    %7 = vector.extract_strided_slice %5 {offsets = [0, 32], sizes = [8, 8], strides = [1, 1]} : vector<8x96xf32> to vector<8x8xf32>
    %8 = vector.extract_strided_slice %5 {offsets = [0, 64], sizes = [8, 8], strides = [1, 1]} : vector<8x96xf32> to vector<8x8xf32>
    %cst_7 = arith.constant dense<0.000000e+00> : vector<8x8xf32>
    %9 = tpu.matmul %6, %7, %cst_7 {dimension_numbers = #tpu.dot_dimension_numbers<[1], [1], [0], [0], [0, 0, 1, 0], [], []>, precision = #tpu.contract_precision<fp32>} : vector<8x8xf32>, vector<8x8xf32>, vector<8x8xf32> -> vector<8x8xf32>
    %cst_8 = arith.constant 0.353553385 : f32
    %10 = vector.broadcast %cst_8 : f32 to vector<8x8xf32>
    %11 = arith.mulf %9, %10 : vector<8x8xf32>
    %12 = vector.broadcast %3 : vector<8x1xf32> to vector<8x8xf32>
    %13 = arith.mulf %11, %12 : vector<8x8xf32>
    %cst_9 = arith.constant dense<0xFF800000> : vector<8xf32>
    %14 = vector.multi_reduction <maximumf>, %13, %cst_9 [1] : vector<8x8xf32> to vector<8xf32>
    %15 = vector.shape_cast %14 : vector<8xf32> to vector<8x1xf32>
    %16 = vector.broadcast %15 : vector<8x1xf32> to vector<8x8xf32>
    %17 = arith.subf %13, %16 : vector<8x8xf32>
    %18 = math.exp %17 : vector<8x8xf32>
    %cst_10 = arith.constant dense<0.000000e+00> : vector<8xf32>
    %19 = vector.multi_reduction <add>, %18, %cst_10 [1] : vector<8x8xf32> to vector<8xf32>
    %20 = vector.shape_cast %19 : vector<8xf32> to vector<8x1xf32>
    %21 = tpu.reciprocal %20 : vector<8x1xf32> -> vector<8x1xf32>
    %22 = vector.broadcast %21 : vector<8x1xf32> to vector<8x8xf32>
    %23 = arith.mulf %18, %22 : vector<8x8xf32>
    %cst_11 = arith.constant dense<0.000000e+00> : vector<8x8xf32>
    %24 = tpu.matmul %23, %8, %cst_11 {dimension_numbers = #tpu.dot_dimension_numbers<[1], [0], [0], [1], [0, 0, 1, 1], [], []>, precision = #tpu.contract_precision<fp32>} : vector<8x8xf32>, vector<8x8xf32>, vector<8x8xf32> -> vector<8x8xf32>
    %25 = vector.extract_strided_slice %5 {offsets = [0, 8], sizes = [8, 8], strides = [1, 1]} : vector<8x96xf32> to vector<8x8xf32>
    %26 = vector.extract_strided_slice %5 {offsets = [0, 40], sizes = [8, 8], strides = [1, 1]} : vector<8x96xf32> to vector<8x8xf32>
    %27 = vector.extract_strided_slice %5 {offsets = [0, 72], sizes = [8, 8], strides = [1, 1]} : vector<8x96xf32> to vector<8x8xf32>
    %cst_12 = arith.constant dense<0.000000e+00> : vector<8x8xf32>
    %28 = tpu.matmul %25, %26, %cst_12 {dimension_numbers = #tpu.dot_dimension_numbers<[1], [1], [0], [0], [0, 0, 1, 0], [], []>, precision = #tpu.contract_precision<fp32>} : vector<8x8xf32>, vector<8x8xf32>, vector<8x8xf32> -> vector<8x8xf32>
    %cst_13 = arith.constant 0.353553385 : f32
    %29 = vector.broadcast %cst_13 : f32 to vector<8x8xf32>
    %30 = arith.mulf %28, %29 : vector<8x8xf32>
    %31 = vector.broadcast %3 : vector<8x1xf32> to vector<8x8xf32>
    %32 = arith.mulf %30, %31 : vector<8x8xf32>
    %cst_14 = arith.constant dense<0xFF800000> : vector<8xf32>
    %33 = vector.multi_reduction <maximumf>, %32, %cst_14 [1] : vector<8x8xf32> to vector<8xf32>
    %34 = vector.shape_cast %33 : vector<8xf32> to vector<8x1xf32>
    %35 = vector.broadcast %34 : vector<8x1xf32> to vector<8x8xf32>
    %36 = arith.subf %32, %35 : vector<8x8xf32>
    %37 = math.exp %36 : vector<8x8xf32>
    %cst_15 = arith.constant dense<0.000000e+00> : vector<8xf32>
    %38 = vector.multi_reduction <add>, %37, %cst_15 [1] : vector<8x8xf32> to vector<8xf32>
    %39 = vector.shape_cast %38 : vector<8xf32> to vector<8x1xf32>
    %40 = tpu.reciprocal %39 : vector<8x1xf32> -> vector<8x1xf32>
    %41 = vector.broadcast %40 : vector<8x1xf32> to vector<8x8xf32>
    %42 = arith.mulf %37, %41 : vector<8x8xf32>
    %cst_16 = arith.constant dense<0.000000e+00> : vector<8x8xf32>
    %43 = tpu.matmul %42, %27, %cst_16 {dimension_numbers = #tpu.dot_dimension_numbers<[1], [0], [0], [1], [0, 0, 1, 1], [], []>, precision = #tpu.contract_precision<fp32>} : vector<8x8xf32>, vector<8x8xf32>, vector<8x8xf32> -> vector<8x8xf32>
    %44 = vector.extract_strided_slice %5 {offsets = [0, 16], sizes = [8, 8], strides = [1, 1]} : vector<8x96xf32> to vector<8x8xf32>
    %45 = vector.extract_strided_slice %5 {offsets = [0, 48], sizes = [8, 8], strides = [1, 1]} : vector<8x96xf32> to vector<8x8xf32>
    %46 = vector.extract_strided_slice %5 {offsets = [0, 80], sizes = [8, 8], strides = [1, 1]} : vector<8x96xf32> to vector<8x8xf32>
    %cst_17 = arith.constant dense<0.000000e+00> : vector<8x8xf32>
    %47 = tpu.matmul %44, %45, %cst_17 {dimension_numbers = #tpu.dot_dimension_numbers<[1], [1], [0], [0], [0, 0, 1, 0], [], []>, precision = #tpu.contract_precision<fp32>} : vector<8x8xf32>, vector<8x8xf32>, vector<8x8xf32> -> vector<8x8xf32>
    %cst_18 = arith.constant 0.353553385 : f32
    %48 = vector.broadcast %cst_18 : f32 to vector<8x8xf32>
    %49 = arith.mulf %47, %48 : vector<8x8xf32>
    %50 = vector.broadcast %3 : vector<8x1xf32> to vector<8x8xf32>
    %51 = arith.mulf %49, %50 : vector<8x8xf32>
    %cst_19 = arith.constant dense<0xFF800000> : vector<8xf32>
    %52 = vector.multi_reduction <maximumf>, %51, %cst_19 [1] : vector<8x8xf32> to vector<8xf32>
    %53 = vector.shape_cast %52 : vector<8xf32> to vector<8x1xf32>
    %54 = vector.broadcast %53 : vector<8x1xf32> to vector<8x8xf32>
    %55 = arith.subf %51, %54 : vector<8x8xf32>
    %56 = math.exp %55 : vector<8x8xf32>
    %cst_20 = arith.constant dense<0.000000e+00> : vector<8xf32>
    %57 = vector.multi_reduction <add>, %56, %cst_20 [1] : vector<8x8xf32> to vector<8xf32>
    %58 = vector.shape_cast %57 : vector<8xf32> to vector<8x1xf32>
    %59 = tpu.reciprocal %58 : vector<8x1xf32> -> vector<8x1xf32>
    %60 = vector.broadcast %59 : vector<8x1xf32> to vector<8x8xf32>
    %61 = arith.mulf %56, %60 : vector<8x8xf32>
    %cst_21 = arith.constant dense<0.000000e+00> : vector<8x8xf32>
    %62 = tpu.matmul %61, %46, %cst_21 {dimension_numbers = #tpu.dot_dimension_numbers<[1], [0], [0], [1], [0, 0, 1, 1], [], []>, precision = #tpu.contract_precision<fp32>} : vector<8x8xf32>, vector<8x8xf32>, vector<8x8xf32> -> vector<8x8xf32>
    %63 = vector.extract_strided_slice %5 {offsets = [0, 24], sizes = [8, 8], strides = [1, 1]} : vector<8x96xf32> to vector<8x8xf32>
    %64 = vector.extract_strided_slice %5 {offsets = [0, 56], sizes = [8, 8], strides = [1, 1]} : vector<8x96xf32> to vector<8x8xf32>
    %65 = vector.extract_strided_slice %5 {offsets = [0, 88], sizes = [8, 8], strides = [1, 1]} : vector<8x96xf32> to vector<8x8xf32>
    %cst_22 = arith.constant dense<0.000000e+00> : vector<8x8xf32>
    %66 = tpu.matmul %63, %64, %cst_22 {dimension_numbers = #tpu.dot_dimension_numbers<[1], [1], [0], [0], [0, 0, 1, 0], [], []>, precision = #tpu.contract_precision<fp32>} : vector<8x8xf32>, vector<8x8xf32>, vector<8x8xf32> -> vector<8x8xf32>
    %cst_23 = arith.constant 0.353553385 : f32
    %67 = vector.broadcast %cst_23 : f32 to vector<8x8xf32>
    %68 = arith.mulf %66, %67 : vector<8x8xf32>
    %69 = vector.broadcast %3 : vector<8x1xf32> to vector<8x8xf32>
    %70 = arith.mulf %68, %69 : vector<8x8xf32>
    %cst_24 = arith.constant dense<0xFF800000> : vector<8xf32>
    %71 = vector.multi_reduction <maximumf>, %70, %cst_24 [1] : vector<8x8xf32> to vector<8xf32>
    %72 = vector.shape_cast %71 : vector<8xf32> to vector<8x1xf32>
    %73 = vector.broadcast %72 : vector<8x1xf32> to vector<8x8xf32>
    %74 = arith.subf %70, %73 : vector<8x8xf32>
    %75 = math.exp %74 : vector<8x8xf32>
    %cst_25 = arith.constant dense<0.000000e+00> : vector<8xf32>
    %76 = vector.multi_reduction <add>, %75, %cst_25 [1] : vector<8x8xf32> to vector<8xf32>
    %77 = vector.shape_cast %76 : vector<8xf32> to vector<8x1xf32>
    %78 = tpu.reciprocal %77 : vector<8x1xf32> -> vector<8x1xf32>
    %79 = vector.broadcast %78 : vector<8x1xf32> to vector<8x8xf32>
    %80 = arith.mulf %75, %79 : vector<8x8xf32>
    %cst_26 = arith.constant dense<0.000000e+00> : vector<8x8xf32>
    %81 = tpu.matmul %80, %65, %cst_26 {dimension_numbers = #tpu.dot_dimension_numbers<[1], [0], [0], [1], [0, 0, 1, 1], [], []>, precision = #tpu.contract_precision<fp32>} : vector<8x8xf32>, vector<8x8xf32>, vector<8x8xf32> -> vector<8x8xf32>
    %82 = tpu.concatenate %24, %43, %62, %81 in 1 : vector<8x8xf32>, vector<8x8xf32>, vector<8x8xf32>, vector<8x8xf32> -> vector<8x32xf32>
    %c0_27 = arith.constant 0 : index
    %c0_28 = arith.constant 0 : index
    %83 = vector.load %arg4[%c0_27, %c0_28] : memref<32x32xf32, #tpu.memory_space<vmem>>, vector<32x32xf32>
    %cst_29 = arith.constant dense<0.000000e+00> : vector<8x32xf32>
    %84 = tpu.matmul %82, %83, %cst_29 {dimension_numbers = #tpu.dot_dimension_numbers<[1], [0], [0], [1], [0, 0, 1, 1], [], []>, precision = #tpu.contract_precision<fp32>} : vector<8x32xf32>, vector<32x32xf32>, vector<8x32xf32> -> vector<8x32xf32>
    %c0_30 = arith.constant 0 : index
    %c0_31 = arith.constant 0 : index
    %85 = vector.load %arg5[%c0_30, %c0_31] : memref<1x32xf32, #tpu.memory_space<vmem>>, vector<1x32xf32>
    %86 = vector.broadcast %85 : vector<1x32xf32> to vector<8x32xf32>
    %87 = arith.addf %84, %86 : vector<8x32xf32>
    %cst_32 = arith.constant 0.000000e+00 : f32
    %88 = vector.broadcast %cst_32 : f32 to vector<8x32xf32>
    %89 = arith.maximumf %87, %88 : vector<8x32xf32>
    %c0_33 = arith.constant 0 : index
    %c0_34 = arith.constant 0 : index
    %90 = vector.load %arg6[%c0_33, %c0_34] : memref<32x64xf32, #tpu.memory_space<vmem>>, vector<32x64xf32>
    %cst_35 = arith.constant dense<0.000000e+00> : vector<8x64xf32>
    %91 = tpu.matmul %89, %90, %cst_35 {dimension_numbers = #tpu.dot_dimension_numbers<[1], [0], [0], [1], [0, 0, 1, 1], [], []>, precision = #tpu.contract_precision<fp32>} : vector<8x32xf32>, vector<32x64xf32>, vector<8x64xf32> -> vector<8x64xf32>
    %c0_36 = arith.constant 0 : index
    %c0_37 = arith.constant 0 : index
    %92 = vector.load %arg7[%c0_36, %c0_37] : memref<1x64xf32, #tpu.memory_space<vmem>>, vector<1x64xf32>
    %93 = vector.broadcast %92 : vector<1x64xf32> to vector<8x64xf32>
    %94 = arith.addf %91, %93 : vector<8x64xf32>
    %cst_38 = arith.constant 0.000000e+00 : f32
    %95 = vector.broadcast %cst_38 : f32 to vector<8x64xf32>
    %96 = arith.maximumf %94, %95 : vector<8x64xf32>
    %c0_39 = arith.constant 0 : index
    %c0_40 = arith.constant 0 : index
    %97 = vector.load %arg8[%c0_39, %c0_40] : memref<64x32xf32, #tpu.memory_space<vmem>>, vector<64x32xf32>
    %cst_41 = arith.constant dense<0.000000e+00> : vector<8x32xf32>
    %98 = tpu.matmul %96, %97, %cst_41 {dimension_numbers = #tpu.dot_dimension_numbers<[1], [0], [0], [1], [0, 0, 1, 1], [], []>, precision = #tpu.contract_precision<fp32>} : vector<8x64xf32>, vector<64x32xf32>, vector<8x32xf32> -> vector<8x32xf32>
    %c0_42 = arith.constant 0 : index
    %c0_43 = arith.constant 0 : index
    %99 = vector.load %arg9[%c0_42, %c0_43] : memref<1x32xf32, #tpu.memory_space<vmem>>, vector<1x32xf32>
    %100 = vector.broadcast %99 : vector<1x32xf32> to vector<8x32xf32>
    %101 = arith.addf %98, %100 : vector<8x32xf32>
    %cst_44 = arith.constant 0.000000e+00 : f32
    %102 = vector.broadcast %cst_44 : f32 to vector<8x32xf32>
    %103 = arith.maximumf %101, %102 : vector<8x32xf32>
    %104 = arith.addf %103, %1 : vector<8x32xf32>
    %105 = vector.shape_cast %104 : vector<8x32xf32> to vector<1x8x32xf32>
    %cst_45 = arith.constant dense<0.000000e+00> : vector<1xf32>
    %106 = vector.multi_reduction <add>, %105, %cst_45 [1, 2] : vector<1x8x32xf32> to vector<1xf32>
    %107 = vector.shape_cast %106 : vector<1xf32> to vector<1x1x1xf32>
    %108 = vector.extract %107[0, 0, 0] : f32 from vector<1x1x1xf32>
    %109 = vector.broadcast %108 : f32 to vector<1x1xf32>
    %cst_46 = arith.constant 2.560000e+02 : f32
    %110 = vector.broadcast %cst_46 : f32 to vector<1x1xf32>
    %111 = arith.divf %109, %110 : vector<1x1xf32>
    %112 = vector.broadcast %111 : vector<1x1xf32> to vector<8x32xf32>
    %113 = arith.subf %104, %112 : vector<8x32xf32>
    %114 = arith.mulf %113, %113 : vector<8x32xf32>
    %115 = vector.shape_cast %114 : vector<8x32xf32> to vector<1x8x32xf32>
    %cst_47 = arith.constant dense<0.000000e+00> : vector<1xf32>
    %116 = vector.multi_reduction <add>, %115, %cst_47 [1, 2] : vector<1x8x32xf32> to vector<1xf32>
    %117 = vector.shape_cast %116 : vector<1xf32> to vector<1x1x1xf32>
    %118 = vector.extract %117[0, 0, 0] : f32 from vector<1x1x1xf32>
    %119 = vector.broadcast %118 : f32 to vector<1x1xf32>
    %cst_48 = arith.constant 2.560000e+02 : f32
    %120 = vector.broadcast %cst_48 : f32 to vector<1x1xf32>
    %121 = arith.divf %119, %120 : vector<1x1xf32>
    %cst_49 = arith.constant 9.99999974E-6 : f32
    %122 = vector.broadcast %cst_49 : f32 to vector<1x1xf32>
    %123 = arith.addf %121, %122 : vector<1x1xf32>
    %124 = math.rsqrt %123 : vector<1x1xf32>
    %125 = vector.broadcast %124 : vector<1x1xf32> to vector<8x32xf32>
    %126 = arith.mulf %113, %125 : vector<8x32xf32>
    %c0_50 = arith.constant 0 : index
    %c0_51 = arith.constant 0 : index
    %127 = vector.load %arg10[%c0_50, %c0_51] : memref<8x32xf32, #tpu.memory_space<vmem>>, vector<8x32xf32>
    %128 = arith.mulf %126, %127 : vector<8x32xf32>
    %c0_52 = arith.constant 0 : index
    %c0_53 = arith.constant 0 : index
    %129 = vector.load %arg11[%c0_52, %c0_53] : memref<8x32xf32, #tpu.memory_space<vmem>>, vector<8x32xf32>
    %130 = arith.addf %128, %129 : vector<8x32xf32>
    %131 = vector.shape_cast %130 : vector<8x32xf32> to vector<1x8x32xf32>
    %c0_54 = arith.constant 0 : index
    %c0_55 = arith.constant 0 : index
    %c0_56 = arith.constant 0 : index
    %132 = vector.load %arg12[%c0_54, %c0_55, %c0_56] : memref<1x8x32xf32, #tpu.memory_space<vmem>>, vector<1x8x32xf32>
    tpu.vector_store %arg12[%c0_54, %c0_55, %c0_56], %131 {strides = array<i32>} : memref<1x8x32xf32, #tpu.memory_space<vmem>>, vector<1x8x32xf32>,
    return
  }
  func.func @transform_0(%arg0: i32) -> (i32, i32, i32) {
    %c0_i32 = arith.constant 0 : i32
    %c0_i32_0 = arith.constant 0 : i32
    %c0_i32_1 = arith.constant 0 : i32
    return %arg0, %c0_i32, %c0_i32_0 : i32, i32, i32
  }
  func.func @transform_1(%arg0: i32) -> (i32, i32, i32) {
    %c0_i32 = arith.constant 0 : i32
    %c0_i32_0 = arith.constant 0 : i32
    %c0_i32_1 = arith.constant 0 : i32
    return %arg0, %c0_i32, %c0_i32_0 : i32, i32, i32
  }
  func.func @transform_2(%arg0: i32) -> (i32, i32) {
    %c0_i32 = arith.constant 0 : i32
    %c0_i32_0 = arith.constant 0 : i32
    %c0_i32_1 = arith.constant 0 : i32
    return %c0_i32, %c0_i32_0 : i32, i32
  }
  func.func @transform_3(%arg0: i32) -> (i32, i32) {
    %c0_i32 = arith.constant 0 : i32
    %c0_i32_0 = arith.constant 0 : i32
    %c0_i32_1 = arith.constant 0 : i32
    return %c0_i32, %c0_i32_0 : i32, i32
  }
  func.func @transform_4(%arg0: i32) -> (i32, i32) {
    %c0_i32 = arith.constant 0 : i32
    %c0_i32_0 = arith.constant 0 : i32
    %c0_i32_1 = arith.constant 0 : i32
    return %c0_i32, %c0_i32_0 : i32, i32
  }
  func.func @transform_5(%arg0: i32) -> (i32, i32) {
    %c0_i32 = arith.constant 0 : i32
    %c0_i32_0 = arith.constant 0 : i32
    %c0_i32_1 = arith.constant 0 : i32
    return %c0_i32, %c0_i32_0 : i32, i32
  }
  func.func @transform_6(%arg0: i32) -> (i32, i32) {
    %c0_i32 = arith.constant 0 : i32
    %c0_i32_0 = arith.constant 0 : i32
    %c0_i32_1 = arith.constant 0 : i32
    return %c0_i32, %c0_i32_0 : i32, i32
  }
  func.func @transform_7(%arg0: i32) -> (i32, i32) {
    %c0_i32 = arith.constant 0 : i32
    %c0_i32_0 = arith.constant 0 : i32
    %c0_i32_1 = arith.constant 0 : i32
    return %c0_i32, %c0_i32_0 : i32, i32
  }
  func.func @transform_8(%arg0: i32) -> (i32, i32) {
    %c0_i32 = arith.constant 0 : i32
    %c0_i32_0 = arith.constant 0 : i32
    %c0_i32_1 = arith.constant 0 : i32
    return %c0_i32, %c0_i32_0 : i32, i32
  }
  func.func @transform_9(%arg0: i32) -> (i32, i32) {
    %c0_i32 = arith.constant 0 : i32
    %c0_i32_0 = arith.constant 0 : i32
    %c0_i32_1 = arith.constant 0 : i32
    return %c0_i32, %c0_i32_0 : i32, i32
  }
  func.func @transform_10(%arg0: i32) -> (i32, i32) {
    %c0_i32 = arith.constant 0 : i32
    %c0_i32_0 = arith.constant 0 : i32
    %c0_i32_1 = arith.constant 0 : i32
    return %c0_i32, %c0_i32_0 : i32, i32
  }
  func.func @transform_11(%arg0: i32) -> (i32, i32, i32) {
    %c0_i32 = arith.constant 0 : i32
    %c0_i32_0 = arith.constant 0 : i32
    %c0_i32_1 = arith.constant 0 : i32
    return %arg0, %c0_i32, %c0_i32_0 : i32, i32, i32
  }
}

</mosaic_0001>

<bundles_post_ra>
// kernel: model_forward.4
= control target key start
LH: loop header
LB: loop body
LE: loop exit
PB: predicated region body
PF: predicated region fallthrough
CT: control target
= control target key end

     0   :  { %s337_s12 = smov 0   ;;  %s371_s0 = inlined_call_operand.vmem [shape: f32[2,1,256], index: 0, kind: input, shape index: {}]   ;;  %s372_s1 = inlined_call_operand.vmem [shape: f32[1,256], index: 1, kind: input, shape index: {}]   ;;  %s373_s2 = inlined_call_operand.vmem [shape: f32[1,256], index: 2, kind: input, shape index: {}]   ;;  %s374_s3 = inlined_call_operand.vmem [shape: f32[2,1,256], index: 3, kind: output, shape index: {}]  }
   0x1 LB: > { %s286_s13 = sadd.s32 4294967295, %s315_s12   ;;  %p290_p0 = scmp.ge.s32.totalorder %s315_s12, 1  ;;  %s315_s12 = sphi %s337_s12, %s13_s12  }
   0x2   : > { %p136_p1 = scmp.lt.s32.totalorder %s315_s12, 3 }
   0x4   : > { %p137_p2 = pnand %p290_p0, %p136_p1 }
   0x5   : > { %p158_p3 = scmp.lt.s32.totalorder (!%p137_p2), %s286_s13, 1 }
   0x6   : > { %140 = sbr.rel (%p137_p2) target bundleno = 460 (0x1cc), region = 32 }
   0xb   : > { %v168_v0 = vlaneseq  ;;  %s376_s13 = smov (!%p158_p3, %s286_s13), 1  ;;  %vm178_vm0 = vcmask 1040384   ;;  %v224_v37 = vld [vmem:[%s372_s1] sm:$0x3] }
   0xc   : > { %s291_s14 = sshll.u32 %s376_s13, 1  ;;  %v226_v39 = vld [vmem:[%s373_s2] sm:$0x3] }
   0xd   : > { %v169_v1 = vshrl.u32 %v168_v0, 7  ;;  %s161_s17 = scalar_lea.vmem %s371_s0, %s291_s14  ;;  %s165_s26 = scalar_lea.vmem %s374_s3, %s291_s14  ;;  %vm230_vm1 = vcmp.lt.s32.totalorder %v168_v0, 256 }
   0xe   : > { %v166_v4 = vld [vmem:[%s161_s17] sm:$0x3] }
   0xf   : > { %v170_v2 = vsub.s32 0, %v169_v1  ;;  %v174_v3 = vsub.s32 1, %v169_v1 }
  0x11   : > { %v171_v5 = vrot.slane %v166_v4, %v170_v2  ;;  %v175_v6 = vrot.slane %v166_v4, %v174_v3 }
  0x13   : > { %v179_v7 = vsel %vm178_vm0, %v171_v5, 0.0  ;;  %v180_v8 = vsel %vm178_vm0, %v175_v6, 0.0 }
  0x14   : > { %v181_v9 = vadd.f32 %v180_v8, %v179_v7 }
  0x16   : > { %182 = vadd.xlane.f32.xlu0 %v181_v9 }
  0x9f   : > { %v183_v10 = vpop.xlane.xlu0 %182 }
  0xa0   : > { %v184_v11 = vrot.slane %v183_v10, 4 }
  0xa2   : > { %v185_v12 = vadd.f32 %v184_v11, %v183_v10 }
  0xa4   : > { %v186_v13 = vrot.slane %v185_v12, 2 }
  0xa6   : > { %v187_v14 = vadd.f32 %v186_v13, %v185_v12 }
  0xa8   : > { %v188_v15 = vrot.slane %v187_v14, 1 }
  0xaa   : > { %v189_v16 = vadd.f32 %v188_v15, %v187_v14 }
  0xac   : > { %295 = vpush %v189_v16 }
  0xdd   : > { %s296_s18 = spop %295 }
  0xde   : > { %v191_v17 = vstv %s296_s18 }
  0xdf   : > { %v193_v18 = vmul.f32 0.00390625, %v191_v17 }
  0xe1   : > { %v194_v19 = vsub.f32 %v166_v4, %v193_v18 }
  0xe3   : > { %v195_v20 = vmul.f32 %v194_v19, %v194_v19 }
  0xe5   : > { %v200_v21 = vrot.slane %v195_v20, %v170_v2  ;;  %v204_v22 = vrot.slane %v195_v20, %v174_v3 }
  0xe7   : > { %v207_v23 = vsel %vm178_vm0, %v200_v21, 0.0  ;;  %v208_v24 = vsel %vm178_vm0, %v204_v22, 0.0 }
  0xe8   : > { %v209_v25 = vadd.f32 %v208_v24, %v207_v23 }
  0xea   : > { %210 = vadd.xlane.f32.xlu0 %v209_v25 }
 0x173   : > { %v211_v26 = vpop.xlane.xlu0 %210 }
 0x174   : > { %v212_v27 = vrot.slane %v211_v26, 4 }
 0x176   : > { %v213_v28 = vadd.f32 %v212_v27, %v211_v26 }
 0x178   : > { %v214_v29 = vrot.slane %v213_v28, 2 }
 0x17a   : > { %v215_v30 = vadd.f32 %v214_v29, %v213_v28 }
 0x17c   : > { %v216_v31 = vrot.slane %v215_v30, 1 }
 0x17e   : > { %v217_v32 = vadd.f32 %v216_v31, %v215_v30 }
 0x180   : > { %297 = vpush %v217_v32 }
 0x1b1   : > { %s298_s19 = spop %297 }
 0x1b2   : > { %v219_v33 = vstv %s298_s19 }
 0x1b3   : > { %v220_v34 = vmul.f32 0.00390625, %v219_v33 }
 0x1b5   : > { %v221_v35 = vadd.f32 1e-05, %v220_v34 }
 0x1b7   : > { %307 = vrsqrt.f32 %v221_v35 }
 0x1c4   : > { %v308_v36 = vpop.eup %307 }
 0x1c5   : > { %v223_v38 = vmul.f32 %v308_v36, %v194_v19 }
 0x1c7   : > { %v225_v40 = vmul.f32 %v224_v37, %v223_v38 }
 0x1c9   : > { %v227_v41 = vadd.f32 %v226_v39, %v225_v40 }
 0x1cb   : > { %232 = vst.msk [vmem:[%s165_s26] sm:$0x3] %vm230_vm1, %v227_v41 }
 0x1cc PF: > { %s13_s12 = sadd.s32 1, %s315_s12  }
 0x1cd   : > { %p10_p4 = scmp.ge.s32.totalorder %s13_s12, 4  }
 0x1cf   :  { %12 = sbr.rel (!%p10_p4) target bundleno = 1 (0x1), region = 62 }

// kernel: model_forward.7
= control target key start
LH: loop header
LB: loop body
LE: loop exit
PB: predicated region body
PF: predicated region fallthrough
CT: control target
= control target key end

     0   :  { %s939_s15 = smov 0   ;;  %s1059_s0 = inlined_call_operand.vmem [shape: f32[2,8,32], index: 0, kind: input, shape index: {}]   ;;  %s1060_s1 = inlined_call_operand.vmem [shape: f32[32,128], index: 1, kind: input, shape index: {}]   ;;  %s1061_s2 = inlined_call_operand.vmem [shape: f32[1,128], index: 2, kind: input, shape index: {}]   ;;  %s1062_s3 = inlined_call_operand.vmem [shape: f32[2,8,1], index: 3, kind: input, shape index: {}]   ;;  %s1063_s4 = inlined_call_operand.vmem [shape: f32[2,8,128], index: 4, kind: output, shape index: {}]  }
   0x1 LB: > { %s784_s16 = sadd.s32 4294967295, %s909_s15   ;;  %p788_p0 = scmp.ge.s32.totalorder %s909_s15, 1  ;;  %s909_s15 = sphi %s939_s15, %s14_s15  }
   0x2   : > { %p170_p1 = scmp.lt.s32.totalorder %s909_s15, 3 }
   0x4   : > { %p171_p2 = pnand %p788_p0, %p170_p1 }
   0x5   : > { %p198_p3 = scmp.lt.s32.totalorder (!%p171_p2), %s784_s16, 1 }
   0x6   : > { %174 = sbr.rel (%p171_p2) target bundleno = 246 (0xf6), region = 36 }
   0xb   : > { %v214_v0 = vld [vmem:[%s1060_s1 + $0x18] sm:$0xff]  ;;  %v213_v1 = vld [vmem:[%s1060_s1 + $0x10] sm:$0xff]  ;;  %v212_v2 = vld [vmem:[%s1060_s1 + $0x8] sm:$0xff]  ;;  %v911_v3 = vmov 0.0   ;;  %vm912_vm0 = vmmov 0   ;;  %s1065_s16 = smov (!%p198_p3, %s784_s16), 1 }
   0xc   : > { %825 = vmatprep.subr.mxu0 %v911_v3  ;;  %v957_v4 = vand.u32 4294901760, %v214_v0  ;;  %836 = vmatprep.subr.mxu1 %v911_v3  ;;  %v960_v5 = vand.u32 4294901760, %v213_v1  ;;  %v962_v6 = vand.u32 4294901760, %v212_v2  ;;  %v211_v7 = vld [vmem:[%s1060_s1] sm:$0xff]  ;;  %v913_v12 = vmov 0   ;;  %s987_s25 = sshll.u32 %s1065_s16, 3 }
   0xd   : > { %v967_v8 = vand.u32 4294901760, %v211_v7  ;;  %833 = vmatprep.mubr.msk.f32.mxu0 %vm912_vm0, %v911_v3  ;;  %844 = vmatprep.mubr.msk.f32.mxu1 %vm912_vm0, %v911_v3  ;;  %vm222_vm1 = vcmask 261120   ;;  %s201_s28 = scalar_lea.vmem %s1059_s0, %s987_s25  ;;  %s205_s5 = scalar_lea.vmem %s1062_s3, %s987_s25  ;;  %v792_v38 = vld [vmem:[%s1061_s2] ss:$0 sm:$0xff] }
   0xe   : > { %826 = vmatpush3.msra.mxu0 %v957_v4  ;;  %v975_v9 = vsub.f32 %v214_v0, %v957_v4  ;;  %v978_v10 = vsub.f32 %v213_v1, %v960_v5  ;;  %v981_v11 = vsub.f32 %v212_v2, %v962_v6  ;;  %902 = vset.pattern.permute.xlu0 %v913_v12  ;;  %v210_v18 = vld [vmem:[%s201_s28] sm:$0xff]  ;;  %s209_s10 = scalar_lea.vmem %s1063_s4, %s987_s25 }
   0xf   : > { %827 = vmatprep.subr.mxu0 %v911_v3  ;;  %v985_v13 = vsub.f32 %v211_v7, %v967_v8  ;;  %v711_v19 = vld [vmem:[%s205_s5] sm:$0xff]  ;;  %v224_v23 = vsel %vm222_vm1, %v210_v18, 0 }
  0x10   : > { %v332_v14 = vand.u32 4294901760, %v975_v9  ;;  %828 = vmatpush3.msra.mxu0 %v960_v5  ;;  %v339_v15 = vand.u32 4294901760, %v978_v10  ;;  %v346_v16 = vand.u32 4294901760, %v981_v11  ;;  %714 = vperm.xlu0 %902, %v711_v19   ;;  %v295_v24 = vand.u32 4294901760, %v224_v23 }
  0x11   : > { %829 = vmatprep.subr.mxu0 %v911_v3  ;;  %v353_v17 = vand.u32 4294901760, %v985_v13 }
  0x12   : > { %v333_v20 = vsub.f32 %v975_v9, %v332_v14  ;;  %v340_v21 = vsub.f32 %v978_v10, %v339_v15  ;;  %830 = vmatpush3.msra.mxu0 %v962_v6  ;;  %v347_v22 = vsub.f32 %v981_v11, %v346_v16  ;;  %v296_v28 = vsub.f32 %v224_v23, %v295_v24 }
  0x13   : > { %831 = vmatprep.subr.mxu0 %v911_v3  ;;  %v354_v27 = vsub.f32 %v985_v13, %v353_v17 }
  0x14   : > { %v334_v25 = vand.u32 4294901760, %v333_v20  ;;  %v341_v26 = vand.u32 4294901760, %v340_v21  ;;  %832 = vmatpush3.msra.mxu0 %v967_v8  ;;  %v348_v29 = vand.u32 4294901760, %v347_v22  ;;  %v297_v30 = vand.u32 4294901760, %v296_v28 }
  0x15   : > { %847 = vmatprep.subr.mxu0 %v911_v3  ;;  %v355_v31 = vand.u32 4294901760, %v354_v27 }
  0x16   : > { %837 = vmatpush3.msra.mxu1 %v334_v25  ;;  %v298_v32 = vsub.f32 %v296_v28, %v297_v30 }
  0x17   : > { %838 = vmatprep.subr.mxu1 %v911_v3 }
  0x18   : > { %839 = vmatpush3.msra.mxu1 %v341_v26  ;;  %v299_v33 = vand.u32 4294901760, %v298_v32 }
  0x19   : > { %840 = vmatprep.subr.mxu1 %v911_v3 }
  0x1a   : > { %841 = vmatpush3.msra.mxu1 %v348_v29  ;;  %834 = vmatmul.mubr.f32.vlgmr.msra.gmra.mxu0 %v299_v33 }
  0x1b   : > { %842 = vmatprep.subr.mxu1 %v911_v3  ;;  %848 = vmatpush3.msra.mxu0 %v975_v9 }
  0x1c   : > { %843 = vmatpush3.msra.mxu1 %v355_v31  ;;  %849 = vmatprep.subr.mxu0 %v911_v3 }
  0x1d   : > { %845 = vmatmul.mubr.f32.vlgmr.msra.gmra.mxu1 %v295_v24  ;;  %858 = vmatprep.subr.mxu1 %v911_v3 }
  0x1e   : > { %859 = vmatpush3.msra.mxu1 %v957_v4  ;;  %850 = vmatpush3.msra.mxu0 %v978_v10 }
  0x1f   : > { %860 = vmatprep.subr.mxu1 %v911_v3  ;;  %851 = vmatprep.subr.mxu0 %v911_v3 }
  0x20   : > { %861 = vmatpush3.msra.mxu1 %v960_v5  ;;  %852 = vmatpush3.msra.mxu0 %v981_v11 }
  0x21   : > { %862 = vmatprep.subr.mxu1 %v911_v3  ;;  %853 = vmatprep.subr.mxu0 %v911_v3 }
  0x22   : > { %863 = vmatpush3.msra.mxu1 %v962_v6  ;;  %854 = vmatpush3.msra.mxu0 %v985_v13 }
  0x23   : > { %855 = vmatprep.mubr.msk.f32.mxu0 %vm912_vm0, %v911_v3  ;;  %864 = vmatprep.subr.mxu1 %v911_v3 }
  0x24   : > { %856 = vmatmul.mubr.f32.vlgmr.msra.gmra.mxu0 %v296_v28  ;;  %865 = vmatpush3.msra.mxu1 %v967_v8 }
  0x25   : > { %866 = vmatprep.mubr.msk.f32.mxu1 %vm912_vm0, %v911_v3  ;;  %869 = vmatprep.subr.mxu0 %v911_v3 }
  0x26   : > { %867 = vmatmul.mubr.f32.vlgmr.msra.gmra.mxu1 %v297_v30  ;;  %870 = vmatpush3.msra.mxu0 %v332_v14 }
  0x27   : > { %880 = vmatprep.subr.mxu1 %v911_v3  ;;  %871 = vmatprep.subr.mxu0 %v911_v3 }
  0x28   : > { %881 = vmatpush3.msra.mxu1 %v957_v4  ;;  %872 = vmatpush3.msra.mxu0 %v339_v15 }
  0x29   : > { %882 = vmatprep.subr.mxu1 %v911_v3  ;;  %873 = vmatprep.subr.mxu0 %v911_v3 }
  0x2a   : > { %883 = vmatpush3.msra.mxu1 %v960_v5  ;;  %874 = vmatpush3.msra.mxu0 %v346_v16 }
  0x2b   : > { %884 = vmatprep.subr.mxu1 %v911_v3  ;;  %875 = vmatprep.subr.mxu0 %v911_v3 }
  0x2c   : > { %885 = vmatpush3.msra.mxu1 %v962_v6  ;;  %876 = vmatpush3.msra.mxu0 %v353_v17 }
  0x2d   : > { %877 = vmatprep.mubr.msk.f32.mxu0 %vm912_vm0, %v911_v3  ;;  %886 = vmatprep.subr.mxu1 %v911_v3 }
  0x2e   : > { %878 = vmatmul.mubr.f32.vlgmr.msra.gmra.mxu0 %v295_v24  ;;  %887 = vmatpush3.msra.mxu1 %v967_v8 }
  0x2f   : > { %888 = vmatprep.mubr.msk.f32.mxu1 %vm912_vm0, %v911_v3 }
  0x30   : > { %889 = vmatmul.mubr.f32.vlgmr.msra.gmra.mxu1 %v295_v24 }
  0x8b   : > { %v715_v49 = vpop.permute.xlu0 %714 }
  0xda   : > { %v301_v34 = vpop.f32.mrf.mxu0 }
  0xdb   : > { %v302_v39 = vadd.f32 %v792_v38, %v301_v34 }
  0xdc   : > { %v835_v36 = vpop.f32.mrf.mxu0 }
  0xdd   : > { %v392_v35 = vpop.f32.mrf.mxu1 }
  0xde   : > { %v393_v43 = vadd.f32 %v392_v35, %v302_v39 }
  0xdf   : > { %v846_v37 = vpop.f32.mrf.mxu1 }
  0xe4   : > { %v472_v40 = vpop.f32.mrf.mxu0 }
  0xe5   : > { %v473_v45 = vadd.f32 %v472_v40, %v393_v43 }
  0xe6   : > { %v549_v41 = vpop.f32.mrf.mxu1  ;;  %v857_v42 = vpop.f32.mrf.mxu0 }
  0xe7   : > { %v550_v46 = vadd.f32 %v549_v41, %v473_v45 }
  0xe8   : > { %v868_v44 = vpop.f32.mrf.mxu1 }
  0xee   : > { %v632_v47 = vpop.f32.mrf.mxu0 }
  0xef   : > { %v633_v48 = vadd.f32 %v632_v47, %v550_v46 }
  0xf0   : > { %v707_v50 = vpop.f32.mrf.mxu1  ;;  %v879_v51 = vpop.f32.mrf.mxu0 }
  0xf1   : > { %v708_v52 = vadd.f32 %v707_v50, %v633_v48 }
  0xf2   : > { %v890_v53 = vpop.f32.mrf.mxu1 }
  0xf3   : > { %v717_v54 = vmul.f32 %v715_v49, %v708_v52 }
  0xf5   : > { %718 = vst [vmem:[%s209_s10] sm:$0xff] %v717_v54 }
  0xf6 PF: > { %s14_s15 = sadd.s32 1, %s909_s15  }
  0xf7   : > { %p11_p4 = scmp.ge.s32.totalorder %s14_s15, 4  }
  0xf9   :  { %13 = sbr.rel (!%p11_p4) target bundleno = 1 (0x1), region = 69 }

// kernel: model_forward.5
= control target key start
LH: loop header
LB: loop body
LE: loop exit
PB: predicated region body
PF: predicated region fallthrough
CT: control target
= control target key end

     0   :  { %s7189_s17 = smov 0   ;;  %s7943_s0 = inlined_call_operand.vmem [shape: f32[2,8,32], index: 0, kind: input, shape index: {}]   ;;  %s7944_s1 = inlined_call_operand.vmem [shape: f32[2,8,1], index: 1, kind: input, shape index: {}]   ;;  %s7945_s2 = inlined_call_operand.vmem [shape: f32[32,96], index: 2, kind: input, shape index: {}]   ;;  %s7946_s3 = inlined_call_operand.vmem [shape: f32[32,32], index: 3, kind: input, shape index: {}]   ;;  %s7947_s4 = inlined_call_operand.vmem [shape: f32[1,32], index: 4, kind: input, shape index: {}]   ;;  %s7948_s5 = inlined_call_operand.vmem [shape: f32[32,64], index: 5, kind: input, shape index: {}]   ;;  %s7949_s6 = inlined_call_operand.vmem [shape: f32[1,64], index: 6, kind: input, shape index: {}]   ;;  %s7950_s7 = inlined_call_operand.vmem [shape: f32[64,32], index: 7, kind: input, shape index: {}]   ;;  %s7951_s8 = inlined_call_operand.vmem [shape: f32[1,32], index: 8, kind: input, shape index: {}]   ;;  %s7952_s9 = inlined_call_operand.vmem [shape: f32[8,32], index: 9, kind: input, shape index: {}]   ;;  %s7953_s10 = inlined_call_operand.vmem [shape: f32[8,32], index: 10, kind: input, shape index: {}]   ;;  %s7954_s11 = inlined_call_operand.vmem [shape: f32[2,8,32], index: 11, kind: output, shape index: {}]  }
   0x1 LB: > { %s6250_s18 = sadd.s32 4294967295, %s7110_s17   ;;  %p6254_p0 = scmp.ge.s32.totalorder %s7110_s17, 1  ;;  %s7110_s17 = sphi %s7189_s17, %s21_s17  }
   0x2   : > { %p345_p1 = scmp.lt.s32.totalorder %s7110_s17, 3 }
   0x4   : > { %p346_p2 = pnand %p6254_p0, %p345_p1 }
   0x5   : > { %p387_p3 = scmp.lt.s32.totalorder (!%p346_p2), %s6250_s18, 1  ;;  %s7115_s15 = smov (!%p346_p2), 96  }
   0x6   : > { %349 = sbr.rel (%p346_p2) target bundleno = 3992 (0xf98), region = 64  ;;  %s7116_s16 = smov (!%p346_p2), 88  }
   0x7   : > { %s7118_s19 = smov (!%p346_p2), 64   ;;  %s7119_s20 = smov (!%p346_p2), 56  }
   0x8   : > { %s7120_s21 = smov (!%p346_p2), 112   ;;  %s7121_s22 = smov (!%p346_p2), 80  }
   0x9   : > { %s7122_s23 = smov (!%p346_p2), 48   ;;  %s7123_s24 = smov (!%p346_p2), 104  }
   0xa   : > { %s7124_s25 = smov (!%p346_p2), 72   ;;  %s7125_s26 = smov (!%p346_p2), 8  }
   0xb   : > { %v404_v0 = vld [vmem:[%s7945_s2 + $0x18] sm:$0xff]  ;;  %v403_v1 = vld [vmem:[%s7945_s2 + $0x10] sm:$0xff]  ;;  %v402_v2 = vld [vmem:[%s7945_s2 + $0x8] sm:$0xff]  ;;  %v7112_v3 = vmov 0.0   ;;  %vm7113_vm0 = vmmov 0   ;;  %s7956_s18 = smov (!%p387_p3, %s6250_s18), 1 }
   0xc   : > { %6503 = vmatprep.subr.mxu0 %v7112_v3  ;;  %v7207_v4 = vand.u32 4294901760, %v404_v0  ;;  %6514 = vmatprep.subr.mxu1 %v7112_v3  ;;  %v7210_v5 = vand.u32 4294901760, %v403_v1  ;;  %v7212_v6 = vand.u32 4294901760, %v402_v2  ;;  %v401_v7 = vld [vmem:[%s7945_s2] sm:$0xff]  ;;  %s7235_s27 = sshll.u32 %s7956_s18, 3  ;;  %vm405_vm1 = vcmask 261120  }
   0xd   : > { %v7217_v8 = vand.u32 4294901760, %v401_v7  ;;  %6511 = vmatprep.mubr.msk.f32.mxu0 %vm7113_vm0, %v7112_v3  ;;  %6522 = vmatprep.mubr.msk.f32.mxu1 %vm7113_vm0, %v7112_v3  ;;  %s7244_s30 = scalar_lea.vmem %s7943_s0, %s7235_s27  ;;  %v7114_v32 = vmov 0   ;;  %s394_s14 = scalar_lea.vmem %s7944_s1, %s7235_s27  ;;  %vm897_vm2 = vcmask 64512   ;;  %vm4588_vm3 = vcmask 130048  }
   0xe   : > { %6504 = vmatpush3.msra.mxu0 %v7207_v4  ;;  %v514_v9 = vsub.f32 %v404_v0, %v7207_v4  ;;  %v7226_v10 = vsub.f32 %v403_v1, %v7210_v5  ;;  %v7229_v11 = vsub.f32 %v402_v2, %v7212_v6  ;;  %v399_v17 = vld [vmem:[%s7244_s30] sm:$0xff]  ;;  %7084 = vset.pattern.permute.xlu0 %v7114_v32  ;;  %s7117_s18 = smov 120   ;;  %s7126_s28 = smov 16   ;;  %vm4590_vm4 = vcmask 195584  }
   0xf   : > { %6505 = vmatprep.subr.mxu0 %v7112_v3  ;;  %v7233_v12 = vsub.f32 %v401_v7, %v7217_v8  ;;  %v407_v21 = vsel %vm405_vm1, %v399_v17, 0  ;;  %v400_v50 = vld [vmem:[%s394_s14] sm:$0xff]  ;;  %s7127_s29 = smov 40   ;;  %vm5607_vm5 = vcmask 523264  }
  0x10   : > { %v515_v13 = vand.u32 4294901760, %v514_v9  ;;  %6506 = vmatpush3.msra.mxu0 %v7210_v5  ;;  %v522_v14 = vand.u32 4294901760, %v7226_v10  ;;  %v529_v15 = vand.u32 4294901760, %v7229_v11  ;;  %v478_v22 = vand.u32 4294901760, %v407_v21 }
  0x11   : > { %6507 = vmatprep.subr.mxu0 %v7112_v3  ;;  %v536_v16 = vand.u32 4294901760, %v7233_v12 }
  0x12   : > { %v516_v18 = vsub.f32 %v514_v9, %v515_v13  ;;  %v523_v19 = vsub.f32 %v7226_v10, %v522_v14  ;;  %6508 = vmatpush3.msra.mxu0 %v7212_v6  ;;  %v530_v20 = vsub.f32 %v7229_v11, %v529_v15  ;;  %v479_v26 = vsub.f32 %v407_v21, %v478_v22 }
  0x13   : > { %6509 = vmatprep.subr.mxu0 %v7112_v3  ;;  %v537_v25 = vsub.f32 %v7233_v12, %v536_v16 }
  0x14   : > { %v517_v23 = vand.u32 4294901760, %v516_v18  ;;  %v524_v24 = vand.u32 4294901760, %v523_v19  ;;  %6510 = vmatpush3.msra.mxu0 %v7217_v8  ;;  %v531_v27 = vand.u32 4294901760, %v530_v20  ;;  %v480_v28 = vand.u32 4294901760, %v479_v26 }
  0x15   : > { %6525 = vmatprep.subr.mxu0 %v7112_v3  ;;  %v538_v29 = vand.u32 4294901760, %v537_v25 }
  0x16   : > { %6515 = vmatpush3.msra.mxu1 %v517_v23  ;;  %v481_v30 = vsub.f32 %v479_v26, %v480_v28 }
  0x17   : > { %6516 = vmatprep.subr.mxu1 %v7112_v3 }
  0x18   : > { %6517 = vmatpush3.msra.mxu1 %v524_v24  ;;  %v482_v31 = vand.u32 4294901760, %v481_v30 }
  0x19   : > { %6518 = vmatprep.subr.mxu1 %v7112_v3 }
  0x1a   : > { %6519 = vmatpush3.msra.mxu1 %v531_v27  ;;  %6512 = vmatmul.mubr.f32.vlgmr.msra.gmra.mxu0 %v482_v31 }
  0x1b   : > { %6520 = vmatprep.subr.mxu1 %v7112_v3  ;;  %6526 = vmatpush3.msra.mxu0 %v514_v9 }
  0x1c   : > { %6521 = vmatpush3.msra.mxu1 %v538_v29  ;;  %6527 = vmatprep.subr.mxu0 %v7112_v3 }
  0x1d   : > { %6523 = vmatmul.mubr.f32.vlgmr.msra.gmra.mxu1 %v478_v22  ;;  %6536 = vmatprep.subr.mxu1 %v7112_v3 }
  0x1e   : > { %6537 = vmatpush3.msra.mxu1 %v7207_v4  ;;  %6528 = vmatpush3.msra.mxu0 %v7226_v10 }
  0x1f   : > { %6538 = vmatprep.subr.mxu1 %v7112_v3  ;;  %6529 = vmatprep.subr.mxu0 %v7112_v3 }
  0x20   : > { %6539 = vmatpush3.msra.mxu1 %v7210_v5  ;;  %6530 = vmatpush3.msra.mxu0 %v7229_v11 }
  0x21   : > { %6540 = vmatprep.subr.mxu1 %v7112_v3  ;;  %6531 = vmatprep.subr.mxu0 %v7112_v3 }
  0x22   : > { %6541 = vmatpush3.msra.mxu1 %v7212_v6  ;;  %6532 = vmatpush3.msra.mxu0 %v7233_v12 }
  0x23   : > { %6533 = vmatprep.mubr.msk.f32.mxu0 %vm7113_vm0, %v7112_v3  ;;  %6542 = vmatprep.subr.mxu1 %v7112_v3 }
  0x24   : > { %6534 = vmatmul.mubr.f32.vlgmr.msra.gmra.mxu0 %v479_v26  ;;  %6543 = vmatpush3.msra.mxu1 %v7217_v8 }
  0x25   : > { %6544 = vmatprep.mubr.msk.f32.mxu1 %vm7113_vm0, %v7112_v3  ;;  %6547 = vmatprep.subr.mxu0 %v7112_v3 }
  0x26   : > { %6545 = vmatmul.mubr.f32.vlgmr.msra.gmra.mxu1 %v480_v28  ;;  %6548 = vmatpush3.msra.mxu0 %v515_v13 }
  0x27   : > { %6558 = vmatprep.subr.mxu1 %v7112_v3  ;;  %6549 = vmatprep.subr.mxu0 %v7112_v3 }
  0x28   : > { %6559 = vmatpush3.msra.mxu1 %v7207_v4  ;;  %6550 = vmatpush3.msra.mxu0 %v522_v14 }
  0x29   : > { %6560 = vmatprep.subr.mxu1 %v7112_v3  ;;  %6551 = vmatprep.subr.mxu0 %v7112_v3 }
  0x2a   : > { %6561 = vmatpush3.msra.mxu1 %v7210_v5  ;;  %6552 = vmatpush3.msra.mxu0 %v529_v15 }
  0x2b   : > { %6562 = vmatprep.subr.mxu1 %v7112_v3  ;;  %6553 = vmatprep.subr.mxu0 %v7112_v3 }
  0x2c   : > { %6563 = vmatpush3.msra.mxu1 %v7212_v6  ;;  %6554 = vmatpush3.msra.mxu0 %v536_v16 }
  0x2d   : > { %6555 = vmatprep.mubr.msk.f32.mxu0 %vm7113_vm0, %v7112_v3  ;;  %6564 = vmatprep.subr.mxu1 %v7112_v3 }
  0x2e   : > { %6556 = vmatmul.mubr.f32.vlgmr.msra.gmra.mxu0 %v478_v22  ;;  %6565 = vmatpush3.msra.mxu1 %v7217_v8 }
  0x2f   : > { %6566 = vmatprep.mubr.msk.f32.mxu1 %vm7113_vm0, %v7112_v3  ;;  %6569 = vmatprep.subr.mxu0 %v7112_v3 }
  0x30   : > { %6567 = vmatmul.mubr.f32.vlgmr.msra.gmra.mxu1 %v478_v22  ;;  %6571 = vmatprep.mubr.msk.f32.mxu0 %vm7113_vm0, %v7112_v3 }
  0x31   : > { %6574 = vmatprep.subr.mxu1 %v7112_v3  ;;  %6576 = vmatprep.mubr.msk.f32.mxu1 %vm7113_vm0, %v7112_v3 }
  0xda   : > { %v484_v33 = vpop.f32.mrf.mxu0 }
  0xdc   : > { %v6513_v35 = vpop.f32.mrf.mxu0 }
  0xdd   : > { %v575_v34 = vpop.f32.mrf.mxu1 }
  0xde   : > { %v576_v40 = vadd.f32 %v575_v34, %v484_v33 }
  0xdf   : > { %v6524_v36 = vpop.f32.mrf.mxu1 }
  0xe4   : > { %v655_v37 = vpop.f32.mrf.mxu0 }
  0xe5   : > { %v656_v42 = vadd.f32 %v655_v37, %v576_v40 }
  0xe6   : > { %v732_v38 = vpop.f32.mrf.mxu1  ;;  %v6535_v39 = vpop.f32.mrf.mxu0 }
  0xe7   : > { %v733_v43 = vadd.f32 %v732_v38, %v656_v42 }
  0xe8   : > { %v6546_v41 = vpop.f32.mrf.mxu1 }
  0xee   : > { %v815_v44 = vpop.f32.mrf.mxu0 }
  0xef   : > { %v816_v45 = vadd.f32 %v815_v44, %v733_v43 }
  0xf0   : > { %v890_v46 = vpop.f32.mrf.mxu1  ;;  %v6557_v47 = vpop.f32.mrf.mxu0 }
  0xf1   : > { %v7300_v48 = vadd.f32 %v890_v46, %v816_v45 }
  0xf2   : > { %v6568_v49 = vpop.f32.mrf.mxu1 }
  0xf3   : > { %895 = vrot.lane.b32.xlu0 %v7300_v48, %s7115_s15  ;;  %v898_v51 = vsel %vm897_vm2, %v7300_v48, 0 }
  0xf4   : > { %v968_v52 = vand.u32 4294901760, %v898_v51 }
  0xf6   : > { %v969_v53 = vsub.f32 %v898_v51, %v968_v52 }
  0xf7   : > { %1351 = vperm.xlu0 %7084, %v400_v50  }
  0xf8   : > { %v970_v54 = vand.u32 4294901760, %v969_v53 }
  0xfa   : > { %v971_v57 = vsub.f32 %v969_v53, %v970_v54 }
  0xfb   : > { %1820 = vrot.lane.b32.xlu0 %v7300_v48, %s7116_s16 }
  0xfc   : > { %v972_v60 = vand.u32 4294901760, %v971_v57 }
  0xff   : > { %1818 = vrot.lane.b32.xlu0 %v7300_v48, %s7117_s18 }
 0x165   : > { %v896_v55 = vpop.permute.xlu0 %895 }
 0x166   : > { %v900_v56 = vsel %vm897_vm2, %v896_v55, 0 }
 0x167   : > { %v933_v58 = vand.u32 4294901760, %v900_v56 }
 0x169   : > { %v1010_v59 = vsub.f32 %v900_v56, %v933_v58  ;;  %6570 = vmatpush3.xpose.msra.mxu0 %v933_v58 }
 0x16a   : > { %6579 = vmatprep.subr.mxu0 %v7112_v3 }
 0x16b   : > { %v1011_v61 = vand.u32 4294901760, %v1010_v59 }
 0x16c   : > { %6572 = vmatmul.mubr.f32.vlgmr.msra.gmra.mxu0 %v972_v60 }
 0x16d   : > { %v1012_v62 = vsub.f32 %v1010_v59, %v1011_v61  ;;  %6580 = vmatpush3.xpose.msra.mxu0 %v1010_v59  ;;  %6581 = vmatprep.mubr.msk.f32.mxu0 %vm7113_vm0, %v7112_v3 }
 0x16e   : > { %6589 = vmatprep.subr.mxu0 %v7112_v3 }
 0x16f   : > { %v1013_v63 = vand.u32 4294901760, %v1012_v62 }
 0x170   : > { %6582 = vmatmul.mubr.f32.vlgmr.msra.gmra.mxu0 %v969_v53 }
 0x171   : > { %6575 = vmatpush3.xpose.msra.mxu1 %v1013_v63  ;;  %6590 = vmatpush3.xpose.msra.mxu0 %v1011_v61 }
 0x172   : > { %6591 = vmatprep.mubr.msk.f32.mxu0 %vm7113_vm0, %v7112_v3  ;;  %6584 = vmatprep.subr.mxu1 %v7112_v3  ;;  %v7330_v19 = vpop.permute.xlu0 %1351 }
 0x173   : > { %6599 = vmatprep.subr.mxu0 %v7112_v3 }
 0x174   : > { %6577 = vmatmul.mubr.f32.vlgmr.msra.gmra.mxu1 %v968_v52  ;;  %6592 = vmatmul.mubr.f32.vlgmr.msra.gmra.mxu0 %v968_v52 }
 0x175   : > { %6585 = vmatpush3.xpose.msra.mxu1 %v933_v58  ;;  %6586 = vmatprep.mubr.msk.f32.mxu1 %vm7113_vm0, %v7112_v3 }
 0x176   : > { %6594 = vmatprep.subr.mxu1 %v7112_v3  ;;  %6601 = vmatprep.mubr.msk.f32.mxu0 %vm7113_vm0, %v7112_v3  ;;  %v1821_v29 = vpop.permute.xlu0 %1820 }
 0x177   : > { %v1824_v32 = vsel %vm897_vm2, %v1821_v29, 0 }
 0x178   : > { %6587 = vmatmul.mubr.f32.vlgmr.msra.gmra.mxu1 %v970_v54  ;;  %v1857_v34 = vand.u32 4294901760, %v1824_v32 }
 0x179   : > { %6595 = vmatpush3.xpose.msra.mxu1 %v933_v58  ;;  %6596 = vmatprep.mubr.msk.f32.mxu1 %vm7113_vm0, %v7112_v3 }
 0x17a   : > { %6604 = vmatprep.subr.mxu1 %v7112_v3  ;;  %v1934_v38 = vsub.f32 %v1824_v32, %v1857_v34  ;;  %v1819_v40 = vpop.permute.xlu0 %1818 }
 0x17b   : > { %v1822_v44 = vsel %vm897_vm2, %v1819_v40, 0 }
 0x17c   : > { %6597 = vmatmul.mubr.f32.vlgmr.msra.gmra.mxu1 %v968_v52  ;;  %v1935_v43 = vand.u32 4294901760, %v1934_v38  ;;  %v1892_v46 = vand.u32 4294901760, %v1822_v44 }
 0x17d   : > { %6606 = vmatprep.mubr.msk.f32.mxu1 %vm7113_vm0, %v7112_v3 }
 0x17e   : > { %v1936_v49 = vsub.f32 %v1934_v38, %v1935_v43  ;;  %v1893_v51 = vsub.f32 %v1822_v44, %v1892_v46 }
 0x180   : > { %v1937_v53 = vand.u32 4294901760, %v1936_v49  ;;  %v1894_v54 = vand.u32 4294901760, %v1893_v51 }
 0x182   : > { %v1895_v55 = vsub.f32 %v1893_v51, %v1894_v54 }
 0x184   : > { %v1896_v56 = vand.u32 4294901760, %v1895_v55 }
 0x22c   : > { %v974_v0 = vpop.f32.mrf.mxu0 }
 0x22e   : > { %v6573_v1 = vpop.f32.mrf.mxu0 }
 0x230   : > { %v1124_v2 = vpop.f32.mrf.mxu0 }
 0x232   : > { %v6583_v4 = vpop.f32.mrf.mxu0 }
 0x234   : > { %v1050_v5 = vpop.f32.mrf.mxu1  ;;  %v1272_v6 = vpop.f32.mrf.mxu0 }
 0x235   : > { %v1051_v7 = vadd.f32 %v1050_v5, %v974_v0 }
 0x236   : > { %v6578_v8 = vpop.f32.mrf.mxu1  ;;  %v6593_v9 = vpop.f32.mrf.mxu0 }
 0x237   : > { %v1125_v10 = vadd.f32 %v1124_v2, %v1051_v7 }
 0x238   : > { %v1198_v11 = vpop.f32.mrf.mxu1 }
 0x239   : > { %v1199_v12 = vadd.f32 %v1198_v11, %v1125_v10 }
 0x23a   : > { %v6588_v13 = vpop.f32.mrf.mxu1 }
 0x23b   : > { %v1273_v14 = vadd.f32 %v1272_v6, %v1199_v12 }
 0x23c   : > { %v1344_v15 = vpop.f32.mrf.mxu1 }
 0x23d   : > { %v1345_v16 = vadd.f32 %v1344_v15, %v1273_v14 }
 0x23e   : > { %v6598_v17 = vpop.f32.mrf.mxu1 }
 0x23f   : > { %v1348_v18 = vmul.f32 0.35355338, %v1345_v16 }
 0x241   : > { %v1354_v20 = vmul.f32 %v7330_v19, %v1348_v18 }
 0x243   : > { %v1355_v21 = vsel %vm897_vm2, %v1354_v20, -inf }
 0x244   : > { %1356 = vmax.xlane.f32.xlu1 %v1355_v21 }
 0x2cd   : > { %v1357_v22 = vpop.xlane.xlu1 %1356 }
 0x2ce   : > { %v1358_v23 = vsub.f32 %v1354_v20, %v1357_v22 }
 0x2d0   : > { %v1359_v24 = vmul.f32 1.442695, %v1358_v23 }
 0x2d2   : > { %7085 = vpow2.f32 %v1359_v24 }
 0x2df   : > { %v7086_v25 = vpop.eup %7085 }
 0x2e0   : > { %v1361_v26 = vsel %vm897_vm2, %v7086_v25, 0.0 }
 0x2e1   : > { %1362 = vadd.xlane.f32.xlu1 %v1361_v26 }
 0x2f2   : > { %1366 = vrot.lane.b32.xlu1 %v7300_v48, %s7118_s19 }
 0x36a   : > { %v1363_v27 = vpop.xlane.xlu1 %1362 }
 0x36b   : > { %7087 = vrcp.f32 %v1363_v27 }
 0x36e   : > { %v1367_v28 = vpop.permute.xlu1 %1366 }
 0x36f   : > { %v1403_v30 = vand.u32 4294901760, %v1367_v28 }
 0x371   : > { %v1480_v31 = vsub.f32 %v1367_v28, %v1403_v30  ;;  %6600 = vmatpush3.msra.mxu0 %v1403_v30 }
 0x372   : > { %6609 = vmatprep.subr.mxu0 %v7112_v3 }
 0x373   : > { %v1481_v33 = vand.u32 4294901760, %v1480_v31 }
 0x375   : > { %v1482_v35 = vsub.f32 %v1480_v31, %v1481_v33 }
 0x377   : > { %v1483_v36 = vand.u32 4294901760, %v1482_v35 }
 0x378   : > { %v7088_v37 = vpop.eup %7087 }
 0x379   : > { %6605 = vmatpush3.msra.mxu1 %v1483_v36  ;;  %v1365_v39 = vmul.f32 %v7088_v37, %v7086_v25 }
 0x37a   : > { %6614 = vmatprep.subr.mxu1 %v7112_v3 }
 0x37b   : > { %v1370_v41 = vsel %vm897_vm2, %v1365_v39, 0 }
 0x37c   : > { %v1438_v42 = vand.u32 4294901760, %v1370_v41 }
 0x37e   : > { %v1439_v45 = vsub.f32 %v1370_v41, %v1438_v42  ;;  %6607 = vmatmul.mubr.f32.vlgmr.msra.gmra.mxu1 %v1438_v42 }
 0x37f   : > { %6615 = vmatpush3.msra.mxu1 %v1403_v30  ;;  %6616 = vmatprep.mubr.msk.f32.mxu1 %vm7113_vm0, %v7112_v3 }
 0x380   : > { %6624 = vmatprep.subr.mxu1 %v7112_v3  ;;  %v1440_v47 = vand.u32 4294901760, %v1439_v45 }
 0x382   : > { %6617 = vmatmul.mubr.f32.vlgmr.msra.gmra.mxu1 %v1440_v47  ;;  %v1441_v50 = vsub.f32 %v1439_v45, %v1440_v47 }
 0x383   : > { %6625 = vmatpush3.msra.mxu1 %v1403_v30  ;;  %6626 = vmatprep.mubr.msk.f32.mxu1 %vm7113_vm0, %v7112_v3 }
 0x384   : > { %6634 = vmatprep.subr.mxu1 %v7112_v3  ;;  %v1442_v52 = vand.u32 4294901760, %v1441_v50 }
 0x386   : > { %6602 = vmatmul.mubr.f32.vlgmr.msra.gmra.mxu0 %v1442_v52  ;;  %6627 = vmatmul.mubr.f32.vlgmr.msra.gmra.mxu1 %v1438_v42 }
 0x387   : > { %6610 = vmatpush3.msra.mxu0 %v1480_v31  ;;  %6635 = vmatpush3.xpose.msra.mxu1 %v1937_v53 }
 0x388   : > { %6611 = vmatprep.mubr.msk.f32.mxu0 %vm7113_vm0, %v7112_v3  ;;  %6619 = vmatprep.subr.mxu0 %v7112_v3 }
 0x389   : > { %6636 = vmatprep.mubr.msk.f32.mxu1 %vm7113_vm0, %v7112_v3  ;;  %6644 = vmatprep.subr.mxu1 %v7112_v3 }
 0x38a   : > { %6612 = vmatmul.mubr.f32.vlgmr.msra.gmra.mxu0 %v1439_v45  ;;  %6637 = vmatmul.mubr.f32.vlgmr.msra.gmra.mxu1 %v1892_v46 }
 0x38b   : > { %6620 = vmatpush3.msra.mxu0 %v1481_v33  ;;  %6645 = vmatpush3.xpose.msra.mxu1 %v1857_v34 }
 0x38c   : > { %6621 = vmatprep.mubr.msk.f32.mxu0 %vm7113_vm0, %v7112_v3  ;;  %6629 = vmatprep.subr.mxu0 %v7112_v3 }
 0x38d   : > { %6646 = vmatprep.mubr.msk.f32.mxu1 %vm7113_vm0, %v7112_v3  ;;  %6654 = vmatprep.subr.mxu1 %v7112_v3 }
 0x38e   : > { %6622 = vmatmul.mubr.f32.vlgmr.msra.gmra.mxu0 %v1438_v42  ;;  %6647 = vmatmul.mubr.f32.vlgmr.msra.gmra.mxu1 %v1894_v54 }
 0x38f   : > { %6630 = vmatpush3.xpose.msra.mxu0 %v1857_v34  ;;  %6655 = vmatpush3.xpose.msra.mxu1 %v1857_v34 }
 0x390   : > { %6631 = vmatprep.mubr.msk.f32.mxu0 %vm7113_vm0, %v7112_v3  ;;  %6639 = vmatprep.subr.mxu0 %v7112_v3 }
 0x391   : > { %6656 = vmatprep.mubr.msk.f32.mxu1 %vm7113_vm0, %v7112_v3  ;;  %6664 = vmatprep.subr.mxu1 %v7112_v3 }
 0x392   : > { %6632 = vmatmul.mubr.f32.vlgmr.msra.gmra.mxu0 %v1896_v56  ;;  %6657 = vmatmul.mubr.f32.vlgmr.msra.gmra.mxu1 %v1892_v46 }
 0x393   : > { %6640 = vmatpush3.xpose.msra.mxu0 %v1934_v38  ;;  %6641 = vmatprep.mubr.msk.f32.mxu0 %vm7113_vm0, %v7112_v3 }
 0x394   : > { %6649 = vmatprep.subr.mxu0 %v7112_v3  ;;  %6666 = vmatprep.mubr.msk.f32.mxu1 %vm7113_vm0, %v7112_v3 }
 0x396   : > { %6642 = vmatmul.mubr.f32.vlgmr.msra.gmra.mxu0 %v1893_v51 }
 0x397   : > { %6650 = vmatpush3.xpose.msra.mxu0 %v1935_v43  ;;  %6651 = vmatprep.mubr.msk.f32.mxu0 %vm7113_vm0, %v7112_v3 }
 0x398   : > { %6659 = vmatprep.subr.mxu0 %v7112_v3 }
 0x39a   : > { %6652 = vmatmul.mubr.f32.vlgmr.msra.gmra.mxu0 %v1892_v46 }
 0x39b   : > { %6661 = vmatprep.mubr.msk.f32.mxu0 %vm7113_vm0, %v7112_v3 }
 0x43e   : > { %v1520_v57 = vpop.f32.mrf.mxu1 }
 0x440   : > { %v6608_v58 = vpop.f32.mrf.mxu1 }
 0x442   : > { %v1668_v59 = vpop.f32.mrf.mxu1 }
 0x444   : > { %v6618_v60 = vpop.f32.mrf.mxu1 }
 0x446   : > { %v1444_v61 = vpop.f32.mrf.mxu0  ;;  %v1814_v62 = vpop.f32.mrf.mxu1 }
 0x447   : > { %v1521_v63 = vadd.f32 %v1520_v57, %v1444_v61 }
 0x448   : > { %v6603_v0 = vpop.f32.mrf.mxu0  ;;  %v6628_v1 = vpop.f32.mrf.mxu1 }
 0x44a   : > { %v1594_v2 = vpop.f32.mrf.mxu0  ;;  %v1974_v4 = vpop.f32.mrf.mxu1 }
 0x44b   : > { %v1595_v5 = vadd.f32 %v1594_v2, %v1521_v63 }
 0x44c   : > { %v6613_v6 = vpop.f32.mrf.mxu0  ;;  %v6638_v7 = vpop.f32.mrf.mxu1 }
 0x44d   : > { %v1669_v8 = vadd.f32 %v1668_v59, %v1595_v5 }
 0x44e   : > { %v1742_v9 = vpop.f32.mrf.mxu0  ;;  %v2122_v10 = vpop.f32.mrf.mxu1 }
 0x44f   : > { %v1743_v11 = vadd.f32 %v1742_v9, %v1669_v8 }
 0x450   : > { %v6623_v12 = vpop.f32.mrf.mxu0  ;;  %v6648_v13 = vpop.f32.mrf.mxu1 }
 0x451   : > { %v7375_v14 = vadd.f32 %v1814_v62, %v1743_v11 }
 0x452   : > { %v1898_v15 = vpop.f32.mrf.mxu0  ;;  %v2268_v16 = vpop.f32.mrf.mxu1 }
 0x453   : > { %v1975_v20 = vadd.f32 %v1974_v4, %v1898_v15 }
 0x454   : > { %v6633_v17 = vpop.f32.mrf.mxu0  ;;  %v6658_v18 = vpop.f32.mrf.mxu1 }
 0x456   : > { %v2048_v21 = vpop.f32.mrf.mxu0 }
 0x457   : > { %v2049_v22 = vadd.f32 %v2048_v21, %v1975_v20 }
 0x458   : > { %v6643_v23 = vpop.f32.mrf.mxu0 }
 0x459   : > { %v2123_v24 = vadd.f32 %v2122_v10, %v2049_v22 }
 0x45a   : > { %v2196_v25 = vpop.f32.mrf.mxu0 }
 0x45b   : > { %v2197_v26 = vadd.f32 %v2196_v25, %v2123_v24 }
 0x45c   : > { %v6653_v27 = vpop.f32.mrf.mxu0 }
 0x45d   : > { %v2269_v28 = vadd.f32 %v2268_v16, %v2197_v26 }
 0x45f   : > { %v2272_v29 = vmul.f32 0.35355338, %v2269_v28 }
 0x461   : > { %v2273_v30 = vmul.f32 %v2272_v29, %v7330_v19 }
 0x463   : > { %v2274_v31 = vsel %vm897_vm2, %v2273_v30, -inf }
 0x464   : > { %2275 = vmax.xlane.f32.xlu0 %v2274_v31 }
 0x47a   : > { %2285 = vrot.lane.b32.xlu0 %v7300_v48, %s7119_s20 }
 0x47e   : > { %2737 = vrot.lane.b32.xlu0 %v7300_v48, %s7120_s21  ;;  %s7128_s21 = smov 24  }
 0x4ed   : > { %v2276_v32 = vpop.xlane.xlu0 %2275 }
 0x4ee   : > { %v2277_v33 = vsub.f32 %v2273_v30, %v2276_v32 }
 0x4f0   : > { %v2278_v34 = vmul.f32 1.442695, %v2277_v33 }
 0x4f1   : > { %v2286_v35 = vpop.permute.xlu0 %2285 }
 0x4f2   : > { %7089 = vpow2.f32 %v2278_v34  ;;  %v2322_v36 = vand.u32 4294901760, %v2286_v35 }
 0x4f4   : > { %v2399_v37 = vsub.f32 %v2286_v35, %v2322_v36  ;;  %6660 = vmatpush3.msra.mxu0 %v2322_v36 }
 0x4f5   : > { %6669 = vmatprep.subr.mxu0 %v7112_v3  ;;  %v2738_v51 = vpop.permute.xlu0 %2737 }
 0x4f6   : > { %v2400_v38 = vand.u32 4294901760, %v2399_v37  ;;  %v2741_v54 = vsel %vm897_vm2, %v2738_v51, 0 }
 0x4f7   : > { %v2811_v57 = vand.u32 4294901760, %v2741_v54 }
 0x4f8   : > { %v2401_v39 = vsub.f32 %v2399_v37, %v2400_v38 }
 0x4f9   : > { %v2812_v61 = vsub.f32 %v2741_v54, %v2811_v57 }
 0x4fa   : > { %v2402_v40 = vand.u32 4294901760, %v2401_v39 }
 0x4fb   : > { %v2813_v0 = vand.u32 4294901760, %v2812_v61 }
 0x4fc   : > { %6665 = vmatpush3.msra.mxu1 %v2402_v40 }
 0x4fd   : > { %6674 = vmatprep.subr.mxu1 %v7112_v3  ;;  %v2814_v1 = vsub.f32 %v2812_v61, %v2813_v0 }
 0x4ff   : > { %v7090_v41 = vpop.eup %7089  ;;  %v2815_v2 = vand.u32 4294901760, %v2814_v1 }
 0x500   : > { %v2280_v42 = vsel %vm897_vm2, %v7090_v41, 0.0 }
 0x501   : > { %2281 = vadd.xlane.f32.xlu1 %v2280_v42 }
 0x512   : > { %2739 = vrot.lane.b32.xlu1 %v7300_v48, %s7121_s22 }
 0x58a   : > { %v2282_v43 = vpop.xlane.xlu1 %2281 }
 0x58b   : > { %7091 = vrcp.f32 %v2282_v43 }
 0x58e   : > { %v2740_v44 = vpop.permute.xlu1 %2739 }
 0x58f   : > { %v2743_v45 = vsel %vm897_vm2, %v2740_v44, 0 }
 0x590   : > { %v2776_v46 = vand.u32 4294901760, %v2743_v45 }
 0x592   : > { %v2853_v49 = vsub.f32 %v2743_v45, %v2776_v46 }
 0x594   : > { %v2854_v55 = vand.u32 4294901760, %v2853_v49 }
 0x596   : > { %v2855_v59 = vsub.f32 %v2853_v49, %v2854_v55 }
 0x598   : > { %v7092_v47 = vpop.eup %7091  ;;  %v2856_v63 = vand.u32 4294901760, %v2855_v59 }
 0x599   : > { %v2284_v50 = vmul.f32 %v7092_v47, %v7090_v41 }
 0x59b   : > { %v2289_v52 = vsel %vm897_vm2, %v2284_v50, 0 }
 0x59c   : > { %v2357_v53 = vand.u32 4294901760, %v2289_v52 }
 0x59e   : > { %v2358_v56 = vsub.f32 %v2289_v52, %v2357_v53  ;;  %6667 = vmatmul.mubr.f32.vlgmr.msra.gmra.mxu1 %v2357_v53 }
 0x59f   : > { %6675 = vmatpush3.msra.mxu1 %v2322_v36  ;;  %6676 = vmatprep.mubr.msk.f32.mxu1 %vm7113_vm0, %v7112_v3 }
 0x5a0   : > { %6684 = vmatprep.subr.mxu1 %v7112_v3  ;;  %v2359_v58 = vand.u32 4294901760, %v2358_v56 }
 0x5a2   : > { %6677 = vmatmul.mubr.f32.vlgmr.msra.gmra.mxu1 %v2359_v58  ;;  %v2360_v60 = vsub.f32 %v2358_v56, %v2359_v58 }
 0x5a3   : > { %6685 = vmatpush3.msra.mxu1 %v2322_v36  ;;  %6686 = vmatprep.mubr.msk.f32.mxu1 %vm7113_vm0, %v7112_v3 }
 0x5a4   : > { %6694 = vmatprep.subr.mxu1 %v7112_v3  ;;  %v2361_v62 = vand.u32 4294901760, %v2360_v60 }
 0x5a6   : > { %6662 = vmatmul.mubr.f32.vlgmr.msra.gmra.mxu0 %v2361_v62  ;;  %6687 = vmatmul.mubr.f32.vlgmr.msra.gmra.mxu1 %v2357_v53 }
 0x5a7   : > { %6670 = vmatpush3.msra.mxu0 %v2399_v37  ;;  %6695 = vmatpush3.xpose.msra.mxu1 %v2856_v63 }
 0x5a8   : > { %6671 = vmatprep.mubr.msk.f32.mxu0 %vm7113_vm0, %v7112_v3  ;;  %6679 = vmatprep.subr.mxu0 %v7112_v3 }
 0x5a9   : > { %6696 = vmatprep.mubr.msk.f32.mxu1 %vm7113_vm0, %v7112_v3  ;;  %6704 = vmatprep.subr.mxu1 %v7112_v3 }
 0x5aa   : > { %6672 = vmatmul.mubr.f32.vlgmr.msra.gmra.mxu0 %v2358_v56  ;;  %6697 = vmatmul.mubr.f32.vlgmr.msra.gmra.mxu1 %v2811_v57 }
 0x5ab   : > { %6680 = vmatpush3.msra.mxu0 %v2400_v38  ;;  %6705 = vmatpush3.xpose.msra.mxu1 %v2776_v46 }
 0x5ac   : > { %6681 = vmatprep.mubr.msk.f32.mxu0 %vm7113_vm0, %v7112_v3  ;;  %6689 = vmatprep.subr.mxu0 %v7112_v3 }
 0x5ad   : > { %6706 = vmatprep.mubr.msk.f32.mxu1 %vm7113_vm0, %v7112_v3  ;;  %6714 = vmatprep.subr.mxu1 %v7112_v3 }
 0x5ae   : > { %6682 = vmatmul.mubr.f32.vlgmr.msra.gmra.mxu0 %v2357_v53  ;;  %6707 = vmatmul.mubr.f32.vlgmr.msra.gmra.mxu1 %v2813_v0 }
 0x5af   : > { %6690 = vmatpush3.xpose.msra.mxu0 %v2776_v46  ;;  %6715 = vmatpush3.xpose.msra.mxu1 %v2776_v46 }
 0x5b0   : > { %6691 = vmatprep.mubr.msk.f32.mxu0 %vm7113_vm0, %v7112_v3  ;;  %6699 = vmatprep.subr.mxu0 %v7112_v3 }
 0x5b1   : > { %6716 = vmatprep.mubr.msk.f32.mxu1 %vm7113_vm0, %v7112_v3  ;;  %6724 = vmatprep.subr.mxu1 %v7112_v3 }
 0x5b2   : > { %6692 = vmatmul.mubr.f32.vlgmr.msra.gmra.mxu0 %v2815_v2  ;;  %6717 = vmatmul.mubr.f32.vlgmr.msra.gmra.mxu1 %v2811_v57 }
 0x5b3   : > { %6700 = vmatpush3.xpose.msra.mxu0 %v2853_v49  ;;  %6701 = vmatprep.mubr.msk.f32.mxu0 %vm7113_vm0, %v7112_v3 }
 0x5b4   : > { %6709 = vmatprep.subr.mxu0 %v7112_v3  ;;  %6726 = vmatprep.mubr.msk.f32.mxu1 %vm7113_vm0, %v7112_v3 }
 0x5b6   : > { %6702 = vmatmul.mubr.f32.vlgmr.msra.gmra.mxu0 %v2812_v61 }
 0x5b7   : > { %6710 = vmatpush3.xpose.msra.mxu0 %v2854_v55  ;;  %6711 = vmatprep.mubr.msk.f32.mxu0 %vm7113_vm0, %v7112_v3 }
 0x5b8   : > { %6719 = vmatprep.subr.mxu0 %v7112_v3 }
 0x5ba   : > { %6712 = vmatmul.mubr.f32.vlgmr.msra.gmra.mxu0 %v2811_v57 }
 0x5bb   : > { %6721 = vmatprep.mubr.msk.f32.mxu0 %vm7113_vm0, %v7112_v3 }
 0x65e   : > { %v2439_v4 = vpop.f32.mrf.mxu1 }
 0x660   : > { %v6668_v5 = vpop.f32.mrf.mxu1 }
 0x662   : > { %v2587_v6 = vpop.f32.mrf.mxu1 }
 0x664   : > { %v6678_v7 = vpop.f32.mrf.mxu1 }
 0x666   : > { %v2363_v8 = vpop.f32.mrf.mxu0  ;;  %v2733_v9 = vpop.f32.mrf.mxu1 }
 0x667   : > { %v2440_v10 = vadd.f32 %v2439_v4, %v2363_v8 }
 0x668   : > { %v6663_v11 = vpop.f32.mrf.mxu0  ;;  %v6688_v12 = vpop.f32.mrf.mxu1 }
 0x66a   : > { %v2513_v13 = vpop.f32.mrf.mxu0  ;;  %v2893_v15 = vpop.f32.mrf.mxu1 }
 0x66b   : > { %v2514_v16 = vadd.f32 %v2513_v13, %v2440_v10 }
 0x66c   : > { %v6673_v17 = vpop.f32.mrf.mxu0  ;;  %v6698_v18 = vpop.f32.mrf.mxu1 }
 0x66d   : > { %v2588_v20 = vadd.f32 %v2587_v6, %v2514_v16 }
 0x66e   : > { %v2661_v21 = vpop.f32.mrf.mxu0  ;;  %v3041_v22 = vpop.f32.mrf.mxu1 }
 0x66f   : > { %v2662_v23 = vadd.f32 %v2661_v21, %v2588_v20 }
 0x670   : > { %v6683_v24 = vpop.f32.mrf.mxu0  ;;  %v6708_v25 = vpop.f32.mrf.mxu1 }
 0x671   : > { %v7422_v26 = vadd.f32 %v2733_v9, %v2662_v23 }
 0x672   : > { %v2817_v27 = vpop.f32.mrf.mxu0  ;;  %v3187_v28 = vpop.f32.mrf.mxu1 }
 0x673   : > { %v2894_v31 = vadd.f32 %v2893_v15, %v2817_v27 }
 0x674   : > { %v6693_v29 = vpop.f32.mrf.mxu0  ;;  %v6718_v30 = vpop.f32.mrf.mxu1 }
 0x676   : > { %v2967_v32 = vpop.f32.mrf.mxu0 }
 0x677   : > { %v2968_v33 = vadd.f32 %v2967_v32, %v2894_v31 }
 0x678   : > { %v6703_v34 = vpop.f32.mrf.mxu0 }
 0x679   : > { %v3042_v35 = vadd.f32 %v3041_v22, %v2968_v33 }
 0x67a   : > { %v3115_v36 = vpop.f32.mrf.mxu0 }
 0x67b   : > { %v3116_v37 = vadd.f32 %v3115_v36, %v3042_v35 }
 0x67c   : > { %v6713_v38 = vpop.f32.mrf.mxu0 }
 0x67d   : > { %v3188_v39 = vadd.f32 %v3187_v28, %v3116_v37 }
 0x67f   : > { %v3191_v40 = vmul.f32 0.35355338, %v3188_v39 }
 0x681   : > { %v3192_v41 = vmul.f32 %v3191_v40, %v7330_v19 }
 0x683   : > { %v3193_v42 = vsel %vm897_vm2, %v3192_v41, -inf }
 0x684   : > { %3194 = vmax.xlane.f32.xlu0 %v3193_v42 }
 0x69a   : > { %3204 = vrot.lane.b32.xlu0 %v7300_v48, %s7122_s23 }
 0x69e   : > { %3656 = vrot.lane.b32.xlu0 %v7300_v48, %s7123_s24 }
 0x70d   : > { %v3195_v43 = vpop.xlane.xlu0 %3194 }
 0x70e   : > { %v3196_v44 = vsub.f32 %v3192_v41, %v3195_v43 }
 0x710   : > { %v3197_v45 = vmul.f32 1.442695, %v3196_v44 }
 0x711   : > { %v3205_v46 = vpop.permute.xlu0 %3204 }
 0x712   : > { %7093 = vpow2.f32 %v3197_v45  ;;  %v3241_v47 = vand.u32 4294901760, %v3205_v46 }
 0x714   : > { %v3318_v49 = vsub.f32 %v3205_v46, %v3241_v47  ;;  %6720 = vmatpush3.msra.mxu0 %v3241_v47 }
 0x715   : > { %6729 = vmatprep.subr.mxu0 %v7112_v3  ;;  %v3657_v62 = vpop.permute.xlu0 %3656 }
 0x716   : > { %v3319_v50 = vand.u32 4294901760, %v3318_v49  ;;  %v3660_v1 = vsel %vm897_vm2, %v3657_v62, 0 }
 0x717   : > { %v3730_v5 = vand.u32 4294901760, %v3660_v1 }
 0x718   : > { %v3320_v51 = vsub.f32 %v3318_v49, %v3319_v50 }
 0x719   : > { %v3731_v9 = vsub.f32 %v3660_v1, %v3730_v5 }
 0x71a   : > { %v3321_v52 = vand.u32 4294901760, %v3320_v51 }
 0x71b   : > { %v3732_v12 = vand.u32 4294901760, %v3731_v9 }
 0x71c   : > { %6725 = vmatpush3.msra.mxu1 %v3321_v52 }
 0x71d   : > { %6734 = vmatprep.subr.mxu1 %v7112_v3  ;;  %v3733_v13 = vsub.f32 %v3731_v9, %v3732_v12 }
 0x71f   : > { %v7094_v53 = vpop.eup %7093  ;;  %v3734_v15 = vand.u32 4294901760, %v3733_v13 }
 0x720   : > { %v3199_v54 = vsel %vm897_vm2, %v7094_v53, 0.0 }
 0x721   : > { %3200 = vadd.xlane.f32.xlu1 %v3199_v54 }
 0x732   : > { %3658 = vrot.lane.b32.xlu1 %v7300_v48, %s7124_s25 }
 0x7aa   : > { %v3201_v55 = vpop.xlane.xlu1 %3200 }
 0x7ab   : > { %7095 = vrcp.f32 %v3201_v55 }
 0x7ae   : > { %v3659_v56 = vpop.permute.xlu1 %3658 }
 0x7af   : > { %v3662_v57 = vsel %vm897_vm2, %v3659_v56, 0 }
 0x7b0   : > { %v3695_v58 = vand.u32 4294901760, %v3662_v57 }
 0x7b2   : > { %v3772_v60 = vsub.f32 %v3662_v57, %v3695_v58 }
 0x7b4   : > { %v3773_v2 = vand.u32 4294901760, %v3772_v60 }
 0x7b6   : > { %v3774_v7 = vsub.f32 %v3772_v60, %v3773_v2 }
 0x7b8   : > { %v7096_v59 = vpop.eup %7095  ;;  %v3775_v11 = vand.u32 4294901760, %v3774_v7 }
 0x7b9   : > { %v3203_v61 = vmul.f32 %v7096_v59, %v7094_v53 }
 0x7bb   : > { %v3208_v63 = vsel %vm897_vm2, %v3203_v61, 0 }
 0x7bc   : > { %v3276_v0 = vand.u32 4294901760, %v3208_v63 }
 0x7be   : > { %v3277_v4 = vsub.f32 %v3208_v63, %v3276_v0  ;;  %6727 = vmatmul.mubr.f32.vlgmr.msra.gmra.mxu1 %v3276_v0 }
 0x7bf   : > { %6735 = vmatpush3.msra.mxu1 %v3241_v47  ;;  %6736 = vmatprep.mubr.msk.f32.mxu1 %vm7113_vm0, %v7112_v3 }
 0x7c0   : > { %6744 = vmatprep.subr.mxu1 %v7112_v3  ;;  %v3278_v6 = vand.u32 4294901760, %v3277_v4 }
 0x7c2   : > { %6737 = vmatmul.mubr.f32.vlgmr.msra.gmra.mxu1 %v3278_v6  ;;  %v3279_v8 = vsub.f32 %v3277_v4, %v3278_v6 }
 0x7c3   : > { %6745 = vmatpush3.msra.mxu1 %v3241_v47  ;;  %6746 = vmatprep.mubr.msk.f32.mxu1 %vm7113_vm0, %v7112_v3 }
 0x7c4   : > { %6754 = vmatprep.subr.mxu1 %v7112_v3  ;;  %v3280_v10 = vand.u32 4294901760, %v3279_v8 }
 0x7c6   : > { %6722 = vmatmul.mubr.f32.vlgmr.msra.gmra.mxu0 %v3280_v10  ;;  %6747 = vmatmul.mubr.f32.vlgmr.msra.gmra.mxu1 %v3276_v0  ;;  %v4595_v10 = vld [vmem:[%s7946_s3 + $0x18] sm:$0xff] }
 0x7c7   : > { %6730 = vmatpush3.msra.mxu0 %v3318_v49  ;;  %6755 = vmatpush3.xpose.msra.mxu1 %v3775_v11  ;;  %v4594_v11 = vld [vmem:[%s7946_s3 + $0x10] sm:$0xff] }
 0x7c8   : > { %6731 = vmatprep.mubr.msk.f32.mxu0 %vm7113_vm0, %v7112_v3  ;;  %6739 = vmatprep.subr.mxu0 %v7112_v3  ;;  %v7501_v13 = vand.u32 4294901760, %v4594_v11 }
 0x7c9   : > { %6756 = vmatprep.mubr.msk.f32.mxu1 %vm7113_vm0, %v7112_v3  ;;  %6764 = vmatprep.subr.mxu1 %v7112_v3 }
 0x7ca   : > { %6732 = vmatmul.mubr.f32.vlgmr.msra.gmra.mxu0 %v3277_v4  ;;  %6757 = vmatmul.mubr.f32.vlgmr.msra.gmra.mxu1 %v3730_v5 }
 0x7cb   : > { %6740 = vmatpush3.msra.mxu0 %v3319_v50  ;;  %6765 = vmatpush3.xpose.msra.mxu1 %v3695_v58 }
 0x7cc   : > { %6741 = vmatprep.mubr.msk.f32.mxu0 %vm7113_vm0, %v7112_v3  ;;  %6749 = vmatprep.subr.mxu0 %v7112_v3 }
 0x7cd   : > { %6766 = vmatprep.mubr.msk.f32.mxu1 %vm7113_vm0, %v7112_v3  ;;  %6774 = vmatprep.subr.mxu1 %v7112_v3 }
 0x7ce   : > { %6742 = vmatmul.mubr.f32.vlgmr.msra.gmra.mxu0 %v3276_v0  ;;  %6767 = vmatmul.mubr.f32.vlgmr.msra.gmra.mxu1 %v3732_v12  ;;  %v7499_v12 = vand.u32 4294901760, %v4595_v10 }
 0x7cf   : > { %6750 = vmatpush3.xpose.msra.mxu0 %v3695_v58  ;;  %6775 = vmatpush3.xpose.msra.mxu1 %v3695_v58 }
 0x7d0   : > { %6751 = vmatprep.mubr.msk.f32.mxu0 %vm7113_vm0, %v7112_v3  ;;  %6759 = vmatprep.subr.mxu0 %v7112_v3 }
 0x7d1   : > { %6776 = vmatprep.mubr.msk.f32.mxu1 %vm7113_vm0, %v7112_v3  ;;  %6784 = vmatprep.subr.mxu1 %v7112_v3 }
 0x7d2   : > { %6752 = vmatmul.mubr.f32.vlgmr.msra.gmra.mxu0 %v3734_v15  ;;  %6777 = vmatmul.mubr.f32.vlgmr.msra.gmra.mxu1 %v3730_v5  ;;  %v7504_v15 = vsub.f32 %v4595_v10, %v7499_v12 }
 0x7d3   : > { %6760 = vmatpush3.xpose.msra.mxu0 %v3772_v60  ;;  %6761 = vmatprep.mubr.msk.f32.mxu0 %vm7113_vm0, %v7112_v3 }
 0x7d4   : > { %6769 = vmatprep.subr.mxu0 %v7112_v3  ;;  %6786 = vmatprep.mubr.msk.f32.mxu1 %vm7113_vm0, %v7112_v3 }
 0x7d6   : > { %6762 = vmatmul.mubr.f32.vlgmr.msra.gmra.mxu0 %v3731_v9 }
 0x7d7   : > { %6770 = vmatpush3.xpose.msra.mxu0 %v3773_v2  ;;  %6771 = vmatprep.mubr.msk.f32.mxu0 %vm7113_vm0, %v7112_v3 }
 0x7d8   : > { %6779 = vmatprep.subr.mxu0 %v7112_v3 }
 0x7da   : > { %6772 = vmatmul.mubr.f32.vlgmr.msra.gmra.mxu0 %v3730_v5 }
 0x7db   : > { %6781 = vmatprep.mubr.msk.f32.mxu0 %vm7113_vm0, %v7112_v3 }
 0x87e   : > { %v3358_v16 = vpop.f32.mrf.mxu1 }
 0x880   : > { %v6728_v17 = vpop.f32.mrf.mxu1 }
 0x881   : > { %v4712_v17 = vand.u32 4294901760, %v7504_v15 }
 0x882   : > { %v3506_v18 = vpop.f32.mrf.mxu1 }
 0x884   : > { %v6738_v20 = vpop.f32.mrf.mxu1 }
 0x885   : > { %v4713_v20 = vsub.f32 %v7504_v15, %v4712_v17 }
 0x886   : > { %v3282_v21 = vpop.f32.mrf.mxu0  ;;  %v3652_v22 = vpop.f32.mrf.mxu1 }
 0x887   : > { %v3359_v51 = vadd.f32 %v3358_v16, %v3282_v21  ;;  %v7507_v16 = vsub.f32 %v4594_v11, %v7501_v13 }
 0x888   : > { %v6723_v23 = vpop.f32.mrf.mxu0  ;;  %v6748_v24 = vpop.f32.mrf.mxu1 }
 0x889   : > { %v4593_v24 = vld [vmem:[%s7946_s3 + $0x8] sm:$0xff] }
 0x88a   : > { %v3432_v25 = vpop.f32.mrf.mxu0  ;;  %v3812_v27 = vpop.f32.mrf.mxu1 }
 0x88b   : > { %v3433_v52 = vadd.f32 %v3432_v25, %v3359_v51  ;;  %v7526_v25 = vand.u32 4294901760, %v4593_v24 }
 0x88c   : > { %v6733_v28 = vpop.f32.mrf.mxu0  ;;  %v6758_v29 = vpop.f32.mrf.mxu1 }
 0x88d   : > { %v3507_v53 = vadd.f32 %v3506_v18, %v3433_v52  ;;  %v4719_v18 = vand.u32 4294901760, %v7507_v16  ;;  %v4592_v28 = vld [vmem:[%s7946_s3] sm:$0xff]  ;;  %v7532_v29 = vsub.f32 %v4593_v24, %v7526_v25 }
 0x88e   : > { %v3580_v30 = vpop.f32.mrf.mxu0  ;;  %v3960_v31 = vpop.f32.mrf.mxu1 }
 0x88f   : > { %v3581_v54 = vadd.f32 %v3580_v30, %v3507_v53  ;;  %v4720_v21 = vsub.f32 %v7507_v16, %v4719_v18  ;;  %v7534_v30 = vand.u32 4294901760, %v4592_v28 }
 0x890   : > { %v6743_v32 = vpop.f32.mrf.mxu0  ;;  %v6768_v33 = vpop.f32.mrf.mxu1 }
 0x891   : > { %v3653_v55 = vadd.f32 %v3652_v22, %v3581_v54  ;;  %v4714_v22 = vand.u32 4294901760, %v4713_v20  ;;  %v4721_v23 = vand.u32 4294901760, %v4720_v21  ;;  %v4726_v32 = vand.u32 4294901760, %v7532_v29 }
 0x892   : > { %v3736_v34 = vpop.f32.mrf.mxu0  ;;  %v4106_v35 = vpop.f32.mrf.mxu1  ;;  %v7540_v33 = vsub.f32 %v4592_v28, %v7534_v30 }
 0x893   : > { %v3813_v38 = vadd.f32 %v3812_v27, %v3736_v34 }
 0x894   : > { %v6753_v36 = vpop.f32.mrf.mxu0  ;;  %v6778_v37 = vpop.f32.mrf.mxu1 }
 0x895   : > { %v4733_v36 = vand.u32 4294901760, %v7540_v33 }
 0x896   : > { %v3886_v39 = vpop.f32.mrf.mxu0 }
 0x897   : > { %v3887_v40 = vadd.f32 %v3886_v39, %v3813_v38  ;;  %v4734_v39 = vsub.f32 %v7540_v33, %v4733_v36 }
 0x898   : > { %v6763_v41 = vpop.f32.mrf.mxu0 }
 0x899   : > { %v3961_v42 = vadd.f32 %v3960_v31, %v3887_v40 }
 0x89a   : > { %v4034_v43 = vpop.f32.mrf.mxu0 }
 0x89b   : > { %v4035_v44 = vadd.f32 %v4034_v43, %v3961_v42  ;;  %v4735_v42 = vand.u32 4294901760, %v4734_v39 }
 0x89c   : > { %v6773_v45 = vpop.f32.mrf.mxu0 }
 0x89d   : > { %v4107_v46 = vadd.f32 %v4106_v35, %v4035_v44  ;;  %v4727_v35 = vsub.f32 %v7532_v29, %v4726_v32 }
 0x89f   : > { %v4110_v47 = vmul.f32 0.35355338, %v4107_v46  ;;  %v4728_v38 = vand.u32 4294901760, %v4727_v35 }
 0x8a1   : > { %v4111_v49 = vmul.f32 %v4110_v47, %v7330_v19 }
 0x8a3   : > { %v4112_v50 = vsel %vm897_vm2, %v4111_v49, -inf }
 0x8a4   : > { %4113 = vmax.xlane.f32.xlu1 %v4112_v50 }
 0x8b5   : > { %4576 = vrot.lane.b32.xlu1 %v7422_v26, %s7125_s26 }
 0x8b9   : > { %4580 = vrot.lane.b32.xlu1 %v3653_v55, %s7126_s28  ;;  %s398_s28 = scalar_lea.vmem %s7954_s11, %s7235_s27 }
 0x92d   : > { %v4114_v56 = vpop.xlane.xlu1 %4113 }
 0x92e   : > { %v4115_v57 = vsub.f32 %v4111_v49, %v4114_v56 }
 0x930   : > { %v4116_v58 = vmul.f32 1.442695, %v4115_v57 }
 0x931   : > { %v4577_v55 = vpop.permute.xlu1 %4576 }
 0x932   : > { %7097 = vpow2.f32 %v4116_v58  ;;  %v4587_v57 = vsel %vm897_vm2, %v7375_v14, %v4577_v55 }
 0x935   : > { %v4581_v56 = vpop.permute.xlu1 %4580 }
 0x936   : > { %v4589_v58 = vsel %vm4588_vm3, %v4587_v57, %v4581_v56  ;;  %v5598_v56 = vld [vmem:[%s7950_s7 + $0x30] sm:$0xff] }
 0x93f   : > { %v7098_v59 = vpop.eup %7097 }
 0x940   : > { %v4118_v19 = vsel %vm897_vm2, %v7098_v59, 0.0 }
 0x941   : > { %4119 = vadd.xlane.f32.xlu0 %v4118_v19 }
 0x957   : > { %4123 = vrot.lane.b32.xlu0 %v7300_v48, %s7127_s29 }
 0x9ca   : > { %v4120_v60 = vpop.xlane.xlu0 %4119 }
 0x9cb   : > { %7099 = vrcp.f32 %v4120_v60 }
 0x9ce   : > { %v4124_v61 = vpop.permute.xlu0 %4123 }
 0x9cf   : > { %v4160_v62 = vand.u32 4294901760, %v4124_v61 }
 0x9d1   : > { %v4237_v63 = vsub.f32 %v4124_v61, %v4160_v62  ;;  %6780 = vmatpush3.msra.mxu0 %v4160_v62 }
 0x9d2   : > { %6789 = vmatprep.subr.mxu0 %v7112_v3 }
 0x9d3   : > { %v4238_v26 = vand.u32 4294901760, %v4237_v63 }
 0x9d5   : > { %v4239_v0 = vsub.f32 %v4237_v63, %v4238_v26 }
 0x9d7   : > { %v4240_v1 = vand.u32 4294901760, %v4239_v0  ;;  %v5095_v0 = vld [vmem:[%s7948_s5 + $0x18] sm:$0xff] }
 0x9d8   : > { %v7100_v2 = vpop.eup %7099 }
 0x9d9   : > { %6785 = vmatpush3.msra.mxu1 %v4240_v1  ;;  %v4122_v4 = vmul.f32 %v7100_v2, %v7098_v59  ;;  %v7607_v1 = vand.u32 4294901760, %v5095_v0  ;;  %v5094_v2 = vld [vmem:[%s7948_s5 + $0x10] sm:$0xff] }
 0x9da   : > { %6794 = vmatprep.subr.mxu1 %v7112_v3 }
 0x9db   : > { %v4127_v5 = vsel %vm897_vm2, %v4122_v4, 0  ;;  %v7613_v4 = vsub.f32 %v5095_v0, %v7607_v1 }
 0x9dc   : > { %v4195_v6 = vand.u32 4294901760, %v4127_v5 }
 0x9de   : > { %v4196_v48 = vsub.f32 %v4127_v5, %v4195_v6  ;;  %6787 = vmatmul.mubr.f32.vlgmr.msra.gmra.mxu1 %v4195_v6  ;;  %v7615_v5 = vand.u32 4294901760, %v5094_v2 }
 0x9df   : > { %6795 = vmatpush3.msra.mxu1 %v4160_v62  ;;  %6796 = vmatprep.mubr.msk.f32.mxu1 %vm7113_vm0, %v7112_v3 }
 0x9e0   : > { %6804 = vmatprep.subr.mxu1 %v7112_v3  ;;  %v4197_v7 = vand.u32 4294901760, %v4196_v48 }
 0x9e2   : > { %6797 = vmatmul.mubr.f32.vlgmr.msra.gmra.mxu1 %v4197_v7  ;;  %v4198_v8 = vsub.f32 %v4196_v48, %v4197_v7  ;;  %v7624_v7 = vsub.f32 %v5094_v2, %v7615_v5 }
 0x9e3   : > { %6805 = vmatpush3.msra.mxu1 %v4160_v62  ;;  %6806 = vmatprep.mubr.msk.f32.mxu1 %vm7113_vm0, %v7112_v3 }
 0x9e4   : > { %v4199_v9 = vand.u32 4294901760, %v4198_v8  ;;  %6820 = vmatprep.subr.mxu1 %v7112_v3  ;;  %v5219_v11 = vand.u32 4294901760, %v7624_v7 }
 0x9e6   : > { %6782 = vmatmul.mubr.f32.vlgmr.msra.gmra.mxu0 %v4199_v9  ;;  %6807 = vmatmul.mubr.f32.vlgmr.msra.gmra.mxu1 %v4195_v6  ;;  %v5092_v9 = vld [vmem:[%s7948_s5] sm:$0xff] }
 0x9e7   : > { %6790 = vmatpush3.msra.mxu0 %v4237_v63  ;;  %6791 = vmatprep.mubr.msk.f32.mxu0 %vm7113_vm0, %v7112_v3 }
 0x9e8   : > { %6799 = vmatprep.subr.mxu0 %v7112_v3  ;;  %6828 = vmatprep.mubr.msk.f32.mxu1 %vm7113_vm0, %v7112_v3 }
 0x9e9   : > { %6821 = vmatpush3.msra.mxu1 %v4714_v22 }
 0x9ea   : > { %6792 = vmatmul.mubr.f32.vlgmr.msra.gmra.mxu0 %v4196_v48  ;;  %6822 = vmatprep.subr.mxu1 %v7112_v3  ;;  %v5212_v48 = vand.u32 4294901760, %v7613_v4 }
 0x9eb   : > { %6800 = vmatpush3.msra.mxu0 %v4238_v26  ;;  %6801 = vmatprep.mubr.msk.f32.mxu0 %vm7113_vm0, %v7112_v3 }
 0x9ec   : > { %6809 = vmatprep.subr.mxu0 %v7112_v3  ;;  %6823 = vmatpush3.msra.mxu1 %v4721_v23  ;;  %v5213_v10 = vsub.f32 %v7613_v4, %v5212_v48 }
 0x9ed   : > { %6824 = vmatprep.subr.mxu1 %v7112_v3 }
 0x9ee   : > { %6802 = vmatmul.mubr.f32.vlgmr.msra.gmra.mxu0 %v4195_v6  ;;  %6825 = vmatpush3.msra.mxu1 %v4728_v38  ;;  %v5093_v6 = vld [vmem:[%s7948_s5 + $0x8] sm:$0xff] }
 0x9ef   : > { %6817 = vmatprep.mubr.msk.f32.mxu0 %vm7113_vm0, %v7112_v3  ;;  %6810 = vmatpush3.msra.mxu0 %v7499_v12  ;;  %v7626_v8 = vand.u32 4294901760, %v5093_v6 }
 0x9f0   : > { %6811 = vmatprep.subr.mxu0 %v7112_v3  ;;  %6826 = vmatprep.subr.mxu1 %v7112_v3 }
 0x9f1   : > { %6812 = vmatpush3.msra.mxu0 %v7501_v13  ;;  %6827 = vmatpush3.msra.mxu1 %v4735_v42 }
 0x9f2   : > { %6813 = vmatprep.subr.mxu0 %v7112_v3  ;;  %6842 = vmatprep.subr.mxu1 %v7112_v3 }
 0x9f3   : > { %6814 = vmatpush3.msra.mxu0 %v7526_v25 }
 0x9f4   : > { %6815 = vmatprep.subr.mxu0 %v7112_v3 }
 0x9f5   : > { %6816 = vmatpush3.msra.mxu0 %v7534_v30 }
 0x9f6   : > { %6831 = vmatprep.subr.mxu0 %v7112_v3 }
 0xa9e   : > { %v4277_v27 = vpop.f32.mrf.mxu1 }
 0xaa0   : > { %v6788_v31 = vpop.f32.mrf.mxu1 }
 0xaa2   : > { %v4425_v34 = vpop.f32.mrf.mxu1 }
 0xaa4   : > { %v6798_v37 = vpop.f32.mrf.mxu1 }
 0xaa6   : > { %v4201_v40 = vpop.f32.mrf.mxu0  ;;  %v4571_v41 = vpop.f32.mrf.mxu1 }
 0xaa7   : > { %v4278_v45 = vadd.f32 %v4277_v27, %v4201_v40 }
 0xaa8   : > { %v6783_v43 = vpop.f32.mrf.mxu0  ;;  %v6808_v44 = vpop.f32.mrf.mxu1 }
 0xaaa   : > { %v4351_v46 = vpop.f32.mrf.mxu0 }
 0xaab   : > { %v4352_v47 = vadd.f32 %v4351_v46, %v4278_v45 }
 0xaac   : > { %v6793_v49 = vpop.f32.mrf.mxu0 }
 0xaad   : > { %v4426_v50 = vadd.f32 %v4425_v34, %v4352_v47 }
 0xaae   : > { %v4499_v51 = vpop.f32.mrf.mxu0 }
 0xaaf   : > { %v4500_v52 = vadd.f32 %v4499_v51, %v4426_v50 }
 0xab0   : > { %v6803_v53 = vpop.f32.mrf.mxu0 }
 0xab1   : > { %v4572_v54 = vadd.f32 %v4571_v41, %v4500_v52 }
 0xab3   : > { %4584 = vrot.lane.b32.xlu0 %v4572_v54, %s7128_s21  ;;  %v5599_v54 = vld [vmem:[%s7950_s7 + $0x38] sm:$0xff] }
 0xab4   : > { %v7719_v55 = vand.u32 4294901760, %v5599_v54 }
 0xab6   : > { %v7725_v57 = vsub.f32 %v5599_v54, %v7719_v55 }
 0xb25   : > { %v4585_v59 = vpop.permute.xlu0 %4584 }
 0xb26   : > { %v4591_v19 = vsel %vm4590_vm4, %v4589_v58, %v4585_v59  ;;  %v7727_v58 = vand.u32 4294901760, %v5598_v56  ;;  %v5597_v59 = vld [vmem:[%s7950_s7 + $0x28] sm:$0xff] }
 0xb27   : > { %v4604_v60 = vsel %vm405_vm1, %v4591_v19, 0  ;;  %v5713_v19 = vand.u32 4294901760, %v7725_v57 }
 0xb28   : > { %v4675_v61 = vand.u32 4294901760, %v4604_v60 }
 0xb2a   : > { %v4676_v62 = vsub.f32 %v4604_v60, %v4675_v61  ;;  %6829 = vmatmul.mubr.f32.vlgmr.msra.gmra.mxu1 %v4675_v61  ;;  %v7736_v60 = vsub.f32 %v5598_v56, %v7727_v58 }
 0xb2b   : > { %6843 = vmatpush3.msra.mxu1 %v7499_v12  ;;  %6850 = vmatprep.mubr.msk.f32.mxu1 %vm7113_vm0, %v7112_v3 }
 0xb2c   : > { %6844 = vmatprep.subr.mxu1 %v7112_v3  ;;  %v4677_v63 = vand.u32 4294901760, %v4676_v62 }
 0xb2d   : > { %6845 = vmatpush3.msra.mxu1 %v7501_v13 }
 0xb2e   : > { %6846 = vmatprep.subr.mxu1 %v7112_v3  ;;  %v4678_v14 = vsub.f32 %v4676_v62, %v4677_v63 }
 0xb2f   : > { %6847 = vmatpush3.msra.mxu1 %v7526_v25 }
 0xb30   : > { %6848 = vmatprep.subr.mxu1 %v7112_v3  ;;  %v4679_v26 = vand.u32 4294901760, %v4678_v14  ;;  %v5720_v14 = vand.u32 4294901760, %v7736_v60 }
 0xb31   : > { %6849 = vmatpush3.msra.mxu1 %v7534_v30 }
 0xb32   : > { %6851 = vmatmul.mubr.f32.vlgmr.msra.gmra.mxu1 %v4677_v63  ;;  %6864 = vmatprep.subr.mxu1 %v7112_v3  ;;  %v5714_v63 = vsub.f32 %v7725_v57, %v5713_v19 }
 0xb33   : > { %6818 = vmatmul.mubr.f32.vlgmr.msra.gmra.mxu0 %v4679_v26  ;;  %6865 = vmatpush3.msra.mxu1 %v7499_v12  ;;  %v7638_v12 = vsub.f32 %v5093_v6, %v7626_v8 }
 0xb34   : > { %6832 = vmatpush3.msra.mxu0 %v7504_v15  ;;  %6866 = vmatprep.subr.mxu1 %v7112_v3  ;;  %v5214_v15 = vand.u32 4294901760, %v5213_v10  ;;  %v5715_v2 = vand.u32 4294901760, %v5714_v63 }
 0xb35   : > { %6833 = vmatprep.subr.mxu0 %v7112_v3  ;;  %6867 = vmatpush3.msra.mxu1 %v7501_v13  ;;  %v7640_v13 = vand.u32 4294901760, %v5092_v9 }
 0xb36   : > { %6834 = vmatpush3.msra.mxu0 %v7507_v16  ;;  %6868 = vmatprep.subr.mxu1 %v7112_v3  ;;  %v5220_v16 = vsub.f32 %v7624_v7, %v5219_v11 }
 0xb37   : > { %6835 = vmatprep.subr.mxu0 %v7112_v3  ;;  %6869 = vmatpush3.msra.mxu1 %v7526_v25 }
 0xb38   : > { %6836 = vmatpush3.msra.mxu0 %v7532_v29  ;;  %6870 = vmatprep.subr.mxu1 %v7112_v3  ;;  %v5221_v20 = vand.u32 4294901760, %v5220_v16 }
 0xb39   : > { %6837 = vmatprep.subr.mxu0 %v7112_v3  ;;  %6839 = vmatprep.mubr.msk.f32.mxu0 %vm7113_vm0, %v7112_v3 }
 0xb3a   : > { %6838 = vmatpush3.msra.mxu0 %v7540_v33  ;;  %6871 = vmatpush3.msra.mxu1 %v7534_v30  ;;  %v6258_v33 = vld [vmem:[%s7947_s4] ss:$0 sm:$0xff] }
 0xb3b   : > { %6872 = vmatprep.mubr.msk.f32.mxu1 %vm7113_vm0, %v7112_v3  ;;  %6840 = vmatmul.mubr.f32.vlgmr.msra.gmra.mxu0 %v4676_v62  ;;  %v5596_v62 = vld [vmem:[%s7950_s7 + $0x20] sm:$0xff] }
 0xb3c   : > { %6853 = vmatprep.subr.mxu0 %v7112_v3  ;;  %6873 = vmatmul.mubr.f32.vlgmr.msra.gmra.mxu1 %v4675_v61  ;;  %v7752_v0 = vand.u32 4294901760, %v5596_v62 }
 0xb3d   : > { %6854 = vmatpush3.msra.mxu0 %v4712_v17  ;;  %6861 = vmatprep.mubr.msk.f32.mxu0 %vm7113_vm0, %v7112_v3  ;;  %v5226_v17 = vand.u32 4294901760, %v7638_v12 }
 0xb3e   : > { %6855 = vmatprep.subr.mxu0 %v7112_v3  ;;  %6886 = vmatprep.subr.mxu1 %v7112_v3  ;;  %v7764_v6 = vsub.f32 %v5596_v62, %v7752_v0 }
 0xb3f   : > { %6856 = vmatpush3.msra.mxu0 %v4719_v18  ;;  %6894 = vmatprep.mubr.msk.f32.mxu1 %vm7113_vm0, %v7112_v3  ;;  %v7649_v18 = vsub.f32 %v5092_v9, %v7640_v13  ;;  %v5227_v21 = vsub.f32 %v7638_v12, %v5226_v17 }
 0xb40   : > { %6857 = vmatprep.subr.mxu0 %v7112_v3  ;;  %6887 = vmatpush3.msra.mxu1 %v5214_v15  ;;  %v5734_v10 = vand.u32 4294901760, %v7764_v6 }
 0xb41   : > { %6858 = vmatpush3.msra.mxu0 %v4726_v32  ;;  %v5233_v22 = vand.u32 4294901760, %v7649_v18  ;;  %6888 = vmatprep.subr.mxu1 %v7112_v3  ;;  %v5228_v23 = vand.u32 4294901760, %v5227_v21  ;;  %v5592_v21 = vld [vmem:[%s7950_s7] sm:$0xff] }
 0xb42   : > { %6859 = vmatprep.subr.mxu0 %v7112_v3  ;;  %6889 = vmatpush3.msra.mxu1 %v5221_v20  ;;  %v5735_v16 = vsub.f32 %v7764_v6, %v5734_v10 }
 0xb43   : > { %6860 = vmatpush3.msra.mxu0 %v4733_v36  ;;  %v5234_v24 = vsub.f32 %v7649_v18, %v5233_v22  ;;  %6890 = vmatprep.subr.mxu1 %v7112_v3 }
 0xb44   : > { %6862 = vmatmul.mubr.f32.vlgmr.msra.gmra.mxu0 %v4675_v61  ;;  %6875 = vmatprep.subr.mxu0 %v7112_v3  ;;  %v7738_v61 = vand.u32 4294901760, %v5597_v59 }
 0xb45   : > { %6883 = vmatprep.mubr.msk.f32.mxu0 %vm7113_vm0, %v7112_v3  ;;  %6876 = vmatpush3.msra.mxu0 %v7607_v1  ;;  %v5235_v25 = vand.u32 4294901760, %v5234_v24 }
 0xb46   : > { %6877 = vmatprep.subr.mxu0 %v7112_v3  ;;  %6891 = vmatpush3.msra.mxu1 %v5228_v23  ;;  %v7750_v26 = vsub.f32 %v5597_v59, %v7738_v61 }
 0xb47   : > { %6878 = vmatpush3.msra.mxu0 %v7615_v5  ;;  %6892 = vmatprep.subr.mxu1 %v7112_v3 }
 0xb48   : > { %6879 = vmatprep.subr.mxu0 %v7112_v3  ;;  %6893 = vmatpush3.msra.mxu1 %v5235_v25  ;;  %v7806_v25 = vand.u32 4294901760, %v5592_v21 }
 0xb49   : > { %6880 = vmatpush3.msra.mxu0 %v7626_v8  ;;  %6908 = vmatprep.subr.mxu1 %v7112_v3 }
 0xb4a   : > { %6881 = vmatprep.subr.mxu0 %v7112_v3 }
 0xb4b   : > { %6882 = vmatpush3.msra.mxu0 %v7640_v13 }
 0xb4c   : > { %6897 = vmatprep.subr.mxu0 %v7112_v3 }
 0xbea   : > { %v4772_v27 = vpop.f32.mrf.mxu1 }
 0xbec   : > { %v6830_v28 = vpop.f32.mrf.mxu1 }
 0xbf2   : > { %v4929_v29 = vpop.f32.mrf.mxu1 }
 0xbf3   : > { %v4681_v30 = vpop.f32.mrf.mxu0 }
 0xbf4   : > { %v6852_v31 = vpop.f32.mrf.mxu1  ;;  %v4682_v34 = vadd.f32 %v6258_v33, %v4681_v30  ;;  %v7819_v30 = vsub.f32 %v5592_v21, %v7806_v25 }
 0xbf5   : > { %v6819_v32 = vpop.f32.mrf.mxu0 }
 0xbf6   : > { %v4773_v37 = vadd.f32 %v4772_v27, %v4682_v34  ;;  %v5762_v34 = vand.u32 4294901760, %v7819_v30 }
 0xbfb   : > { %v4852_v35 = vpop.f32.mrf.mxu0 }
 0xbfc   : > { %v5087_v36 = vpop.f32.mrf.mxu1  ;;  %v4853_v40 = vadd.f32 %v4852_v35, %v4773_v37 }
 0xbfd   : > { %v6841_v38 = vpop.f32.mrf.mxu0 }
 0xbfe   : > { %v6874_v39 = vpop.f32.mrf.mxu1  ;;  %v4930_v41 = vadd.f32 %v4929_v29, %v4853_v40 }
 0xc04   : > { %v5012_v42 = vpop.f32.mrf.mxu0 }
 0xc05   : > { %v5013_v43 = vadd.f32 %v5012_v42, %v4930_v41 }
 0xc06   : > { %v6863_v44 = vpop.f32.mrf.mxu0 }
 0xc07   : > { %v5088_v45 = vadd.f32 %v5087_v36, %v5013_v43  ;;  %v5763_v36 = vsub.f32 %v7819_v30, %v5762_v34  ;;  %v6259_v44 = vld [vmem:[%s7949_s6] ss:$0 sm:$0xff] }
 0xc09   : > { %v5091_v46 = vmax.f32 %v5088_v45, 0.0  ;;  %v5764_v37 = vand.u32 4294901760, %v5763_v36 }
 0xc0b   : > { %v5104_v47 = vsel %vm405_vm1, %v5091_v46, 0 }
 0xc0c   : > { %v5175_v49 = vand.u32 4294901760, %v5104_v47 }
 0xc0e   : > { %v5176_v50 = vsub.f32 %v5104_v47, %v5175_v49  ;;  %6895 = vmatmul.mubr.f32.vlgmr.msra.gmra.mxu1 %v5175_v49 }
 0xc0f   : > { %6909 = vmatpush3.msra.mxu1 %v7607_v1  ;;  %6916 = vmatprep.mubr.msk.f32.mxu1 %vm7113_vm0, %v7112_v3 }
 0xc10   : > { %6910 = vmatprep.subr.mxu1 %v7112_v3  ;;  %v5177_v51 = vand.u32 4294901760, %v5176_v50 }
 0xc11   : > { %6911 = vmatpush3.msra.mxu1 %v7615_v5 }
 0xc12   : > { %6912 = vmatprep.subr.mxu1 %v7112_v3  ;;  %v5178_v52 = vsub.f32 %v5176_v50, %v5177_v51 }
 0xc13   : > { %6913 = vmatpush3.msra.mxu1 %v7626_v8 }
 0xc14   : > { %6914 = vmatprep.subr.mxu1 %v7112_v3  ;;  %v5179_v53 = vand.u32 4294901760, %v5178_v52 }
 0xc15   : > { %6915 = vmatpush3.msra.mxu1 %v7640_v13 }
 0xc16   : > { %6917 = vmatmul.mubr.f32.vlgmr.msra.gmra.mxu1 %v5177_v51  ;;  %6930 = vmatprep.subr.mxu1 %v7112_v3 }
 0xc17   : > { %6884 = vmatmul.mubr.f32.vlgmr.msra.gmra.mxu0 %v5179_v53  ;;  %6931 = vmatpush3.msra.mxu1 %v7607_v1  ;;  %v5595_v1 = vld [vmem:[%s7950_s7 + $0x18] sm:$0xff] }
 0xc18   : > { %6898 = vmatpush3.msra.mxu0 %v7613_v4  ;;  %6932 = vmatprep.subr.mxu1 %v7112_v3  ;;  %v5721_v4 = vsub.f32 %v7736_v60, %v5720_v14 }
 0xc19   : > { %6899 = vmatprep.subr.mxu0 %v7112_v3  ;;  %6933 = vmatpush3.msra.mxu1 %v7615_v5  ;;  %v5727_v5 = vand.u32 4294901760, %v7750_v26 }
 0xc1a   : > { %6900 = vmatpush3.msra.mxu0 %v7624_v7  ;;  %6934 = vmatprep.subr.mxu1 %v7112_v3  ;;  %v5594_v7 = vld [vmem:[%s7950_s7 + $0x10] sm:$0xff] }
 0xc1b   : > { %6901 = vmatprep.subr.mxu0 %v7112_v3  ;;  %6935 = vmatpush3.msra.mxu1 %v7626_v8  ;;  %v5722_v8 = vand.u32 4294901760, %v5721_v4  ;;  %v5728_v9 = vsub.f32 %v7750_v26, %v5727_v5 }
 0xc1c   : > { %6902 = vmatpush3.msra.mxu0 %v7638_v12  ;;  %6936 = vmatprep.subr.mxu1 %v7112_v3 }
 0xc1d   : > { %6903 = vmatprep.subr.mxu0 %v7112_v3  ;;  %6905 = vmatprep.mubr.msk.f32.mxu0 %vm7113_vm0, %v7112_v3  ;;  %v5729_v15 = vand.u32 4294901760, %v5728_v9 }
 0xc1e   : > { %6904 = vmatpush3.msra.mxu0 %v7649_v18  ;;  %6937 = vmatpush3.msra.mxu1 %v7640_v13  ;;  %v5593_v13 = vld [vmem:[%s7950_s7 + $0x8] sm:$0xff] }
 0xc1f   : > { %6938 = vmatprep.mubr.msk.f32.mxu1 %vm7113_vm0, %v7112_v3  ;;  %6906 = vmatmul.mubr.f32.vlgmr.msra.gmra.mxu0 %v5176_v50  ;;  %v7793_v18 = vand.u32 4294901760, %v5593_v13 }
 0xc20   : > { %6919 = vmatprep.subr.mxu0 %v7112_v3  ;;  %6939 = vmatmul.mubr.f32.vlgmr.msra.gmra.mxu1 %v5175_v49 }
 0xc21   : > { %6920 = vmatpush3.msra.mxu0 %v5212_v48  ;;  %6927 = vmatprep.mubr.msk.f32.mxu0 %vm7113_vm0, %v7112_v3  ;;  %v7767_v48 = vand.u32 4294901760, %v5595_v1  ;;  %v7804_v24 = vsub.f32 %v5593_v13, %v7793_v18 }
 0xc22   : > { %6921 = vmatprep.subr.mxu0 %v7112_v3  ;;  %6960 = vmatprep.subr.mxu1 %v7112_v3 }
 0xc23   : > { %6922 = vmatpush3.msra.mxu0 %v5219_v11  ;;  %6976 = vmatprep.mubr.msk.f32.mxu1 %vm7113_vm0, %v7112_v3  ;;  %v7777_v11 = vand.u32 4294901760, %v5594_v7  ;;  %v7781_v12 = vsub.f32 %v5595_v1, %v7767_v48  ;;  %v5755_v29 = vand.u32 4294901760, %v7804_v24 }
 0xc24   : > { %6923 = vmatprep.subr.mxu0 %v7112_v3  ;;  %6961 = vmatpush3.msra.mxu1 %v5715_v2 }
 0xc25   : > { %6924 = vmatpush3.msra.mxu0 %v5226_v17  ;;  %6962 = vmatprep.subr.mxu1 %v7112_v3  ;;  %v7791_v17 = vsub.f32 %v5594_v7, %v7777_v11  ;;  %v5741_v20 = vand.u32 4294901760, %v7781_v12  ;;  %v5756_v33 = vsub.f32 %v7804_v24, %v5755_v29 }
 0xc26   : > { %6925 = vmatprep.subr.mxu0 %v7112_v3  ;;  %6963 = vmatpush3.msra.mxu1 %v5722_v8 }
 0xc27   : > { %6926 = vmatpush3.msra.mxu0 %v5233_v22  ;;  %6964 = vmatprep.subr.mxu1 %v7112_v3  ;;  %v5736_v22 = vand.u32 4294901760, %v5735_v16  ;;  %v5748_v23 = vand.u32 4294901760, %v7791_v17  ;;  %v5742_v27 = vsub.f32 %v7781_v12, %v5741_v20  ;;  %v5757_v35 = vand.u32 4294901760, %v5756_v33 }
 0xc28   : > { %6928 = vmatmul.mubr.f32.vlgmr.msra.gmra.mxu0 %v5175_v49  ;;  %6941 = vmatprep.subr.mxu0 %v7112_v3 }
 0xc29   : > { %6957 = vmatprep.mubr.msk.f32.mxu0 %vm7113_vm0, %v7112_v3  ;;  %6942 = vmatpush3.msra.mxu0 %v7719_v55  ;;  %v5749_v28 = vsub.f32 %v7791_v17, %v5748_v23  ;;  %v5743_v31 = vand.u32 4294901760, %v5742_v27 }
 0xc2a   : > { %6943 = vmatprep.subr.mxu0 %v7112_v3  ;;  %6965 = vmatpush3.msra.mxu1 %v5729_v15 }
 0xc2b   : > { %6944 = vmatpush3.msra.mxu0 %v7727_v58  ;;  %6966 = vmatprep.subr.mxu1 %v7112_v3  ;;  %v5750_v32 = vand.u32 4294901760, %v5749_v28 }
 0xc2c   : > { %6945 = vmatprep.subr.mxu0 %v7112_v3  ;;  %6967 = vmatpush3.msra.mxu1 %v5736_v22 }
 0xc2d   : > { %6946 = vmatpush3.msra.mxu0 %v7738_v61  ;;  %6968 = vmatprep.subr.mxu1 %v7112_v3 }
 0xc2e   : > { %6947 = vmatprep.subr.mxu0 %v7112_v3  ;;  %6969 = vmatpush3.msra.mxu1 %v5743_v31 }
 0xc2f   : > { %6948 = vmatpush3.msra.mxu0 %v7752_v0  ;;  %6970 = vmatprep.subr.mxu1 %v7112_v3 }
 0xc30   : > { %6949 = vmatprep.subr.mxu0 %v7112_v3  ;;  %6971 = vmatpush3.msra.mxu1 %v5750_v32 }
 0xc31   : > { %6950 = vmatpush3.msra.mxu0 %v7767_v48  ;;  %6972 = vmatprep.subr.mxu1 %v7112_v3 }
 0xc32   : > { %6951 = vmatprep.subr.mxu0 %v7112_v3  ;;  %6973 = vmatpush3.msra.mxu1 %v5757_v35 }
 0xc33   : > { %6952 = vmatpush3.msra.mxu0 %v7777_v11  ;;  %6974 = vmatprep.subr.mxu1 %v7112_v3 }
 0xc34   : > { %6953 = vmatprep.subr.mxu0 %v7112_v3  ;;  %6975 = vmatpush3.msra.mxu1 %v5764_v37 }
 0xc35   : > { %6954 = vmatpush3.msra.mxu0 %v7793_v18  ;;  %6998 = vmatprep.subr.mxu1 %v7112_v3 }
 0xc36   : > { %6955 = vmatprep.subr.mxu0 %v7112_v3 }
 0xc37   : > { %6956 = vmatpush3.msra.mxu0 %v7806_v25 }
 0xc38   : > { %6979 = vmatprep.subr.mxu0 %v7112_v3 }
 0xcce   : > { %v5272_v38 = vpop.f32.mrf.mxu1 }
 0xcd0   : > { %v6896_v39 = vpop.f32.mrf.mxu1 }
 0xcd6   : > { %v5429_v40 = vpop.f32.mrf.mxu1 }
 0xcd7   : > { %v5181_v41 = vpop.f32.mrf.mxu0 }
 0xcd8   : > { %v6918_v42 = vpop.f32.mrf.mxu1  ;;  %v5182_v45 = vadd.f32 %v6259_v44, %v5181_v41 }
 0xcd9   : > { %v6885_v43 = vpop.f32.mrf.mxu0 }
 0xcda   : > { %v5273_v49 = vadd.f32 %v5272_v38, %v5182_v45 }
 0xcdf   : > { %v5352_v46 = vpop.f32.mrf.mxu0 }
 0xce0   : > { %v5587_v47 = vpop.f32.mrf.mxu1  ;;  %v5353_v52 = vadd.f32 %v5352_v46, %v5273_v49  ;;  %v6180_v46 = vld [vmem:[%s7952_s9] sm:$0xff] }
 0xce1   : > { %v6907_v50 = vpop.f32.mrf.mxu0  ;;  %v6182_v49 = vld [vmem:[%s7953_s10] sm:$0xff] }
 0xce2   : > { %v6940_v51 = vpop.f32.mrf.mxu1  ;;  %v5430_v53 = vadd.f32 %v5429_v40, %v5353_v52 }
 0xce8   : > { %v5512_v54 = vpop.f32.mrf.mxu0 }
 0xce9   : > { %v5513_v56 = vadd.f32 %v5512_v54, %v5430_v53 }
 0xcea   : > { %v6929_v59 = vpop.f32.mrf.mxu0 }
 0xceb   : > { %v5588_v62 = vadd.f32 %v5587_v47, %v5513_v56 }
 0xced   : > { %v5591_v63 = vmax.f32 %v5588_v62, 0.0 }
 0xcef   : > { %v5609_v1 = vsel %vm5607_vm5, %v5591_v63, 0 }
 0xcf0   : > { %v7839_v2 = vand.u32 4294901760, %v5609_v1 }
 0xcf2   : > { %v5685_v4 = vsub.f32 %v5609_v1, %v7839_v2  ;;  %6977 = vmatmul.mubr.f32.vlgmr.msra.gmra.mxu1 %v7839_v2 }
 0xcf3   : > { %6999 = vmatpush3.msra.mxu1 %v7719_v55  ;;  %7014 = vmatprep.mubr.msk.f32.mxu1 %vm7113_vm0, %v7112_v3 }
 0xcf4   : > { %7000 = vmatprep.subr.mxu1 %v7112_v3  ;;  %v5686_v7 = vand.u32 4294901760, %v5685_v4 }
 0xcf5   : > { %7001 = vmatpush3.msra.mxu1 %v7727_v58 }
 0xcf6   : > { %7002 = vmatprep.subr.mxu1 %v7112_v3  ;;  %v5687_v8 = vsub.f32 %v5685_v4, %v5686_v7 }
 0xcf7   : > { %7003 = vmatpush3.msra.mxu1 %v7738_v61 }
 0xcf8   : > { %7004 = vmatprep.subr.mxu1 %v7112_v3  ;;  %v5688_v9 = vand.u32 4294901760, %v5687_v8 }
 0xcf9   : > { %7005 = vmatpush3.msra.mxu1 %v7752_v0 }
 0xcfa   : > { %7006 = vmatprep.subr.mxu1 %v7112_v3  ;;  %6958 = vmatmul.mubr.f32.vlgmr.msra.gmra.mxu0 %v5688_v9 }
 0xcfb   : > { %6980 = vmatpush3.msra.mxu0 %v7725_v57  ;;  %7007 = vmatpush3.msra.mxu1 %v7767_v48 }
 0xcfc   : > { %6981 = vmatprep.subr.mxu0 %v7112_v3  ;;  %7008 = vmatprep.subr.mxu1 %v7112_v3 }
 0xcfd   : > { %6982 = vmatpush3.msra.mxu0 %v7736_v60  ;;  %7009 = vmatpush3.msra.mxu1 %v7777_v11 }
 0xcfe   : > { %6983 = vmatprep.subr.mxu0 %v7112_v3  ;;  %7010 = vmatprep.subr.mxu1 %v7112_v3 }
 0xcff   : > { %6984 = vmatpush3.msra.mxu0 %v7750_v26  ;;  %7011 = vmatpush3.msra.mxu1 %v7793_v18 }
 0xd00   : > { %6985 = vmatprep.subr.mxu0 %v7112_v3  ;;  %7012 = vmatprep.subr.mxu1 %v7112_v3 }
 0xd01   : > { %6986 = vmatpush3.msra.mxu0 %v7764_v6  ;;  %7013 = vmatpush3.msra.mxu1 %v7806_v25 }
 0xd02   : > { %6987 = vmatprep.subr.mxu0 %v7112_v3  ;;  %7015 = vmatmul.mubr.f32.vlgmr.msra.gmra.mxu1 %v5686_v7 }
 0xd03   : > { %7036 = vmatprep.subr.mxu1 %v7112_v3  ;;  %6988 = vmatpush3.msra.mxu0 %v7781_v12 }
 0xd04   : > { %7037 = vmatpush3.msra.mxu1 %v7719_v55  ;;  %6989 = vmatprep.subr.mxu0 %v7112_v3 }
 0xd05   : > { %7038 = vmatprep.subr.mxu1 %v7112_v3  ;;  %6990 = vmatpush3.msra.mxu0 %v7791_v17 }
 0xd06   : > { %7039 = vmatpush3.msra.mxu1 %v7727_v58  ;;  %6991 = vmatprep.subr.mxu0 %v7112_v3 }
 0xd07   : > { %7040 = vmatprep.subr.mxu1 %v7112_v3  ;;  %6992 = vmatpush3.msra.mxu0 %v7804_v24 }
 0xd08   : > { %7041 = vmatpush3.msra.mxu1 %v7738_v61  ;;  %6993 = vmatprep.subr.mxu0 %v7112_v3 }
 0xd09   : > { %7042 = vmatprep.subr.mxu1 %v7112_v3  ;;  %6994 = vmatpush3.msra.mxu0 %v7819_v30 }
 0xd0a   : > { %6995 = vmatprep.mubr.msk.f32.mxu0 %vm7113_vm0, %v7112_v3  ;;  %7043 = vmatpush3.msra.mxu1 %v7752_v0  ;;  %v6260_v0 = vld [vmem:[%s7951_s8] ss:$0 sm:$0xff] }
 0xd0b   : > { %6996 = vmatmul.mubr.f32.vlgmr.msra.gmra.mxu0 %v5685_v4  ;;  %7017 = vmatprep.subr.mxu0 %v7112_v3 }
 0xd0c   : > { %7044 = vmatprep.subr.mxu1 %v7112_v3  ;;  %7018 = vmatpush3.msra.mxu0 %v5713_v19 }
 0xd0d   : > { %7045 = vmatpush3.msra.mxu1 %v7767_v48  ;;  %7019 = vmatprep.subr.mxu0 %v7112_v3 }
 0xd0e   : > { %7046 = vmatprep.subr.mxu1 %v7112_v3  ;;  %7020 = vmatpush3.msra.mxu0 %v5720_v14 }
 0xd0f   : > { %7047 = vmatpush3.msra.mxu1 %v7777_v11  ;;  %7021 = vmatprep.subr.mxu0 %v7112_v3 }
 0xd10   : > { %7048 = vmatprep.subr.mxu1 %v7112_v3  ;;  %7022 = vmatpush3.msra.mxu0 %v5727_v5 }
 0xd11   : > { %7049 = vmatpush3.msra.mxu1 %v7793_v18  ;;  %7023 = vmatprep.subr.mxu0 %v7112_v3  ;;  %v7103_v18 = vld [vmem:[%s7244_s30] sm:$0xff] }
 0xd12   : > { %7050 = vmatprep.subr.mxu1 %v7112_v3  ;;  %7024 = vmatpush3.msra.mxu0 %v5734_v10 }
 0xd13   : > { %7051 = vmatpush3.msra.mxu1 %v7806_v25  ;;  %7052 = vmatprep.mubr.msk.f32.mxu1 %vm7113_vm0, %v7112_v3 }
 0xd14   : > { %7025 = vmatprep.subr.mxu0 %v7112_v3  ;;  %7053 = vmatmul.mubr.f32.vlgmr.msra.gmra.mxu1 %v7839_v2 }
 0xd15   : > { %7026 = vmatpush3.msra.mxu0 %v5741_v20  ;;  %7033 = vmatprep.mubr.msk.f32.mxu0 %vm7113_vm0, %v7112_v3 }
 0xd16   : > { %7027 = vmatprep.subr.mxu0 %v7112_v3 }
 0xd17   : > { %7028 = vmatpush3.msra.mxu0 %v5748_v23 }
 0xd18   : > { %7029 = vmatprep.subr.mxu0 %v7112_v3 }
 0xd19   : > { %7030 = vmatpush3.msra.mxu0 %v5755_v29 }
 0xd1a   : > { %7031 = vmatprep.subr.mxu0 %v7112_v3 }
 0xd1b   : > { %7032 = vmatpush3.msra.mxu0 %v5762_v34 }
 0xd1c   : > { %7034 = vmatmul.mubr.f32.vlgmr.msra.gmra.mxu0 %v7839_v2 }
 0xdb2   : > { %v5801_v55 = vpop.f32.mrf.mxu1 }
 0xdb4   : > { %v6978_v57 = vpop.f32.mrf.mxu1 }
 0xdba   : > { %v5690_v58 = vpop.f32.mrf.mxu0 }
 0xdbb   : > { %v5691_v5 = vadd.f32 %v6260_v0, %v5690_v58 }
 0xdbc   : > { %v6959_v19 = vpop.f32.mrf.mxu0 }
 0xdbd   : > { %v5802_v6 = vadd.f32 %v5801_v55, %v5691_v5 }
 0xdc2   : > { %v5970_v60 = vpop.f32.mrf.mxu1 }
 0xdc4   : > { %v7016_v61 = vpop.f32.mrf.mxu1 }
 0xdcb   : > { %v5889_v14 = vpop.f32.mrf.mxu0 }
 0xdcc   : > { %v5890_v10 = vadd.f32 %v5889_v14, %v5802_v6 }
 0xdcd   : > { %v6997_v26 = vpop.f32.mrf.mxu0 }
 0xdce   : > { %v5971_v11 = vadd.f32 %v5970_v60, %v5890_v10 }
 0xdd4   : > { %v6144_v3 = vpop.f32.mrf.mxu1 }
 0xdd6   : > { %v7054_v48 = vpop.f32.mrf.mxu1 }
 0xddc   : > { %v6065_v12 = vpop.f32.mrf.mxu0 }
 0xddd   : > { %v6066_v13 = vadd.f32 %v6065_v12, %v5971_v11 }
 0xdde   : > { %v7035_v15 = vpop.f32.mrf.mxu0 }
 0xddf   : > { %v6145_v16 = vadd.f32 %v6144_v3, %v6066_v13 }
 0xde1   : > { %v6148_v17 = vmax.f32 %v6145_v16, 0.0 }
 0xde3   : > { %v6149_v20 = vadd.f32 %v7103_v18, %v6148_v17 }
 0xde5   : > { %v6150_v21 = vsel %vm405_vm1, %v6149_v20, 0.0 }
 0xde6   : > { %6151 = vadd.xlane.f32.xlu1 %v6150_v21 }
 0xe6f   : > { %v6152_v22 = vpop.xlane.xlu1 %6151 }
 0xe70   : > { %v6153_v23 = vrot.slane %v6152_v22, 4 }
 0xe72   : > { %v6154_v24 = vadd.f32 %v6153_v23, %v6152_v22 }
 0xe74   : > { %v6155_v25 = vrot.slane %v6154_v24, 2 }
 0xe76   : > { %v6156_v27 = vadd.f32 %v6155_v25, %v6154_v24 }
 0xe78   : > { %v6157_v28 = vrot.slane %v6156_v27, 1 }
 0xe7a   : > { %v6158_v29 = vadd.f32 %v6157_v28, %v6156_v27 }
 0xe7c   : > { %7055 = vpush %v6158_v29 }
 0xead   : > { %s7056_s20 = spop %7055 }
 0xeae   : > { %v6160_v30 = vstv %s7056_s20 }
 0xeaf   : > { %v6162_v31 = vmul.f32 0.00390625, %v6160_v30 }
 0xeb1   : > { %v6163_v32 = vsub.f32 %v6149_v20, %v6162_v31 }
 0xeb3   : > { %v6164_v33 = vmul.f32 %v6163_v32, %v6163_v32 }
 0xeb5   : > { %v6165_v34 = vsel %vm405_vm1, %v6164_v33, 0.0 }
 0xeb6   : > { %6166 = vadd.xlane.f32.xlu0 %v6165_v34 }
 0xf3f   : > { %v6167_v35 = vpop.xlane.xlu0 %6166 }
 0xf40   : > { %v6168_v36 = vrot.slane %v6167_v35, 4 }
 0xf42   : > { %v6169_v37 = vadd.f32 %v6168_v36, %v6167_v35 }
 0xf44   : > { %v6170_v38 = vrot.slane %v6169_v37, 2 }
 0xf46   : > { %v6171_v39 = vadd.f32 %v6170_v38, %v6169_v37 }
 0xf48   : > { %v6172_v40 = vrot.slane %v6171_v39, 1 }
 0xf4a   : > { %v6173_v41 = vadd.f32 %v6172_v40, %v6171_v39 }
 0xf4c   : > { %7057 = vpush %v6173_v41 }
 0xf7d   : > { %s7058_s30 = spop %7057 }
 0xf7e   : > { %v6175_v42 = vstv %s7058_s30 }
 0xf7f   : > { %v6176_v43 = vmul.f32 0.00390625, %v6175_v42 }
 0xf81   : > { %v6177_v44 = vadd.f32 1e-05, %v6176_v43 }
 0xf83   : > { %7101 = vrsqrt.f32 %v6177_v44 }
 0xf90   : > { %v7102_v45 = vpop.eup %7101 }
 0xf91   : > { %v6179_v47 = vmul.f32 %v7102_v45, %v6163_v32 }
 0xf93   : > { %v6181_v50 = vmul.f32 %v6180_v46, %v6179_v47 }
 0xf95   : > { %v6183_v51 = vadd.f32 %v6182_v49, %v6181_v50 }
 0xf97   : > { %6184 = vst.msk [vmem:[%s398_s28] sm:$0xff] %vm405_vm1, %v6183_v51 }
 0xf98 PF: > { %s21_s17 = sadd.s32 1, %s7110_s17  }
 0xf99   : > { %p18_p4 = scmp.ge.s32.totalorder %s21_s17, 4  }
 0xf9b   :  { %20 = sbr.rel (!%p18_p4) target bundleno = 1 (0x1), region = 97 }

</bundles_post_ra>
